<compile_context>
chip_gen: v5e
topology: v5e:2x2
jax: 0.10.0
libtpu: 0.0.40
codegen_flags: <defaults>
</compile_context>

<pallas_src>
from functools import partial

import jax
import jax.numpy as jnp
from jax.experimental import pallas as pl
from jax.experimental.pallas import tpu as pltpu


def cross_attention_kernel(q_ref, kv_ref, mask_ref,
                           wq_ref, wkv_ref, wproj_ref, bproj_ref,
                           o_ref, *, num_heads, seq_len, compute_dtype):
    """One grid step == TB batch elements.

    q_ref     : (TB*N, C)      GEMM-ready activation rows
    kv_ref    : (TB*N, C)
    mask_ref  : (TB*H, N, N)   additive mask
    wq_ref    : (C, C)         Wq^T with `scale` pre-folded   (x @ W layout)
    wkv_ref   : (C, 2C)        Wkv^T: [:, :C] = K, [:, C:] = V
    wproj_ref : (C, C)         Wproj^T
    bproj_ref : (1, C)
    o_ref     : (TB*N, C)
    """
    BN, C = q_ref.shape
    N = seq_len
    H = num_heads
    hd = C // H
    TB = BN // N
    G = TB * H
    f32 = jnp.float32
    approx_rcp = jnp.dtype(compute_dtype) != jnp.dtype(jnp.float32)

    xq = q_ref[...].astype(compute_dtype)                       # (TB*N, C)
    xkv = kv_ref[...].astype(compute_dtype)                     # (TB*N, C)

    # --- fused projections: two full-width 2-D GEMMs on the MXU -------------
    qp = jnp.dot(xq, wq_ref[...], preferred_element_type=f32)   # (TB*N, C), scaled
    kvp = jnp.dot(xkv, wkv_ref[...], preferred_element_type=f32)  # (TB*N, 2C)

    # --- head split: lane -> sublane retile (XLU), once, in f32; cast once --
    def split_heads(x):                                         # (TB*N, C) -> (G, N, hd)
        x4 = x.reshape(TB, N, H, hd).transpose(0, 2, 1, 3)      # (TB, H, N, hd)
        return x4.reshape(G, N, hd).astype(compute_dtype)

    qh = split_heads(qp)
    kh = split_heads(kvp[:, :C])
    vh = split_heads(kvp[:, C:])

    # --- attention scores + additive mask (f32 elementwise math) ------------
    s = jnp.einsum('gnd,gmd->gnm', qh, kh,
                   preferred_element_type=f32)                  # (G, N, N)
    s = s + mask_ref[...].astype(f32)

    # --- softmax with deferred normalization; attn_drop(p=0.0) is identity --
    m = jnp.max(s, axis=-1, keepdims=True)
    p = jnp.exp(s - m)                                          # unnormalized probs
    l = jnp.sum(p, axis=-1, keepdims=True)                      # (G, N, 1)

    o = jnp.einsum('gnm,gmd->gnd', p.astype(compute_dtype), vh,
                   preferred_element_type=f32)                  # (G, N, hd)
    o = o * pl.reciprocal(l, approx=approx_rcp)                 # EUP slot

    # --- concat heads (sublane -> lane retile) + single (C,C) projection ----
    oc = (o.reshape(TB, H, N, hd)
            .transpose(0, 2, 1, 3)                              # (TB, N, H, hd)
            .reshape(BN, C)
            .astype(compute_dtype))
    x = jnp.dot(oc, wproj_ref[...], preferred_element_type=f32)  # (TB*N, C)
    x = x + bproj_ref[...].astype(f32)                          # proj_drop(p=0.0) identity
    o_ref[...] = x.astype(o_ref.dtype)


# ----------------------------------------------------------------------------
# Generation-aware blocking helpers
# ----------------------------------------------------------------------------
def _vmem_limit_bytes():
    """Scoped-VMEM request: half of physical (64 MiB v7x, 128 MiB v5e/v6e),
    clamped to [16, 64] MiB so it is legal on every generation."""
    phys = 64 << 20
    try:
        phys = int(pltpu.get_tpu_info().vmem_capacity_bytes)
    except Exception:
        pass
    return min(max(phys // 2, 16 << 20), 64 << 20)


def _min_grid_steps():
    """Megacore chips want >=2 'parallel' grid steps; single-TC chips want
    the fattest possible single step (extra steps = pure serial overhead)."""
    try:
        kind = jax.devices()[0].device_kind.lower()
    except Exception:
        return 1
    return 2 if any(t in kind for t in ("v7", "v4", "v5p")) else 1


def _per_batch_vmem_bytes(N, C, H, act_itemsize, mask_itemsize, comp_itemsize):
    """Per-batch-element VMEM footprint: double-buffered DMA blocks PLUS the
    live in-kernel intermediates (dominated by the f32 (H,N,N) score/prob)."""
    io = 2 * (3 * N * C * act_itemsize + H * N * N * mask_itemsize)
    inter = (2 * H * N * N * 4                   # s, p (f32)
             + H * N * N * comp_itemsize         # p cast for the PV matmul
             + 3 * N * C * 4                     # qp, kvp (2C) f32
             + 3 * N * C * comp_itemsize         # qh, kh, vh
             + 2 * N * C * 4                     # o (f32), x (f32)
             + N * C * comp_itemsize)            # oc
    return io + inter


def _pick_batch_block(B, N, per_batch_bytes, *, vmem_budget, min_steps):
    # d == B is always layout-legal (block == full array); otherwise keep the
    # (8,128) sublane rule for the (TB*N, C) activation/output blocks.
    valid = [d for d in range(1, B + 1)
             if B % d == 0 and (d == B or (d * N) % 8 == 0)]
    fitting = [d for d in valid if d * per_batch_bytes <= vmem_budget]
    pool = fitting if fitting else valid[:1]          # smallest legal if nothing fits
    pref = [d for d in pool if B // d >= min(min_steps, B)]
    pool = pref if pref else pool
    return max(pool)


# ----------------------------------------------------------------------------
# Wrapper
# ----------------------------------------------------------------------------
def cross_attention(q, kv, mask, wq, wkv, wproj, bproj, *, num_heads,
                    scale=None, compute_dtype=jnp.bfloat16, mask_dtype=None,
                    batch_block=None, interpret=False):
    """Pallas CrossAttention forward.

    q, kv : (B, N, C);  mask : (B, H, N, N) additive.
    wq (C, C), wkv (2C, C), wproj (C, C) in torch nn.Linear (out, in) layout;
    bproj (C,).  qkv_bias=False, attn_drop=proj_drop=0.0 (module defaults).
    """
    B, N, C = q.shape
    H = num_heads
    assert C % H == 0
    hd = C // H
    if scale is None:
        scale = hd ** -0.5
    if mask_dtype is None:
        mask_dtype = compute_dtype      # use jnp.float32 for fine-grained learned biases

    # ---- one-time weight plumbing (plain JAX): x @ W layouts, scale folded --
    wq_m = (wq.T * jnp.asarray(scale, wq.dtype)).astype(compute_dtype)   # (C, C)
    wkv_m = wkv.T.astype(compute_dtype)                                  # (C, 2C): [:, :C]=K, [:, C:]=V
    wp_m = wproj.T.astype(compute_dtype)                                 # (C, C)
    bp_m = bproj.reshape(1, C).astype(jnp.float32)

    # ---- flatten activations/mask so kernel blocks are GEMM-ready -----------
    q2 = q.reshape(B * N, C)
    kv2 = kv.reshape(B * N, C)
    mask2 = mask.reshape(B * H, N, N).astype(mask_dtype)

    # ---- generation-aware batch blocking ------------------------------------
    per_b = _per_batch_vmem_bytes(N, C, H, q.dtype.itemsize,
                                  jnp.dtype(mask_dtype).itemsize,
                                  jnp.dtype(compute_dtype).itemsize)
    vmem_limit = _vmem_limit_bytes()
    if batch_block is None:
        TB = _pick_batch_block(B, N, per_b, vmem_budget=int(0.6 * vmem_limit),
                               min_steps=_min_grid_steps())
    else:
        TB = batch_block
    assert B % TB == 0
    grid = (B // TB,)

    kernel = partial(cross_attention_kernel, num_heads=H, seq_len=N,
                     compute_dtype=compute_dtype)
    out2 = pl.pallas_call(
        kernel,
        out_shape=jax.ShapeDtypeStruct((B * N, C), q.dtype),
        grid_spec=pltpu.PrefetchScalarGridSpec(
            num_scalar_prefetch=0,
            grid=grid,
            in_specs=[
                pl.BlockSpec((TB * N, C), lambda b: (b, 0)),         # q rows
                pl.BlockSpec((TB * N, C), lambda b: (b, 0)),         # kv rows
                pl.BlockSpec((TB * H, N, N), lambda b: (b, 0, 0)),   # additive mask
                # Weights/bias: constant block index -> Pallas skips re-DMA
                # across grid steps (no per-step refetch).
                pl.BlockSpec((C, C), lambda b: (0, 0)),              # Wq (scaled)
                pl.BlockSpec((C, 2 * C), lambda b: (0, 0)),          # Wkv
                pl.BlockSpec((C, C), lambda b: (0, 0)),              # Wproj
                pl.BlockSpec((1, C), lambda b: (0, 0)),              # bias
            ],
            out_specs=pl.BlockSpec((TB * N, C), lambda b: (b, 0)),
        ),
        compiler_params=pltpu.CompilerParams(
            dimension_semantics=("parallel",),
            vmem_limit_bytes=vmem_limit),
        interpret=interpret,
    )(q2, kv2, mask2, wq_m, wkv_m, wp_m, bp_m)
    return out2.reshape(B, N, C)


def cross_attention_reference(q, kv, mask, wq, wkv, wproj, bproj, *, num_heads, scale=None):
    """Pure-JAX f32 mirror of the PyTorch forward, for correctness checking."""
    B, N, C = q.shape
    H = num_heads
    hd = C // H
    if scale is None:
        scale = hd ** -0.5
    Q = q @ wq.T
    KV = kv @ wkv.T
    Qh = Q.reshape(B, N, H, hd).transpose(0, 2, 1, 3)                 # (B, H, N, hd)
    KVh = KV.reshape(B, N, 2, H, hd).transpose(2, 0, 3, 1, 4)         # (2, B, H, N, hd)
    k, v = KVh[0], KVh[1]
    attn = jnp.einsum('bhnd,bhmd->bhnm', Qh, k) * scale + mask
    attn = jax.nn.softmax(attn, axis=-1)
    x = jnp.einsum('bhnm,bhmd->bhnd', attn, v)
    x = x.transpose(0, 2, 1, 3).reshape(B, N, C)
    return x @ wproj.T + bproj


if __name__ == "__main__":
    # Small shapes consistent with the module: dim=32, num_heads=8 -> head_dim=4.
    B, N, C, H = 2, 8, 32, 8
    hd = C // H
    scale = hd ** (-0.5)

    key = jax.random.PRNGKey(0)
    k_q, k_kv, k_mask, k_wq, k_wkv, k_wp, k_bp = jax.random.split(key, 7)

    q = jax.random.normal(k_q, (B, N, C), dtype=jnp.float32)
    kv = jax.random.normal(k_kv, (B, N, C), dtype=jnp.float32)
    mask = 0.1 * jax.random.normal(k_mask, (B, H, N, N), dtype=jnp.float32)

    # torch nn.Linear-style (out, in) weights; qkv_bias=False, proj has bias.
    bound = 1.0 / (C ** 0.5)
    wq = jax.random.uniform(k_wq, (C, C), minval=-bound, maxval=bound, dtype=jnp.float32)
    wkv = jax.random.uniform(k_wkv, (2 * C, C), minval=-bound, maxval=bound, dtype=jnp.float32)
    wproj = jax.random.uniform(k_wp, (C, C), minval=-bound, maxval=bound, dtype=jnp.float32)
    bproj = jax.random.uniform(k_bp, (C,), minval=-bound, maxval=bound, dtype=jnp.float32)

    ref = cross_attention_reference(q, kv, mask, wq, wkv, wproj, bproj,
                                    num_heads=H, scale=scale)

    # Tight structural check with the full-precision compute path (f32 mask).
    out_f32 = jax.block_until_ready(
        cross_attention(q, kv, mask, wq, wkv, wproj, bproj,
                        num_heads=H, scale=scale, compute_dtype=jnp.float32))
    assert out_f32.shape == (B, N, C)
    err32 = float(jnp.max(jnp.abs(out_f32 - ref)))
    assert err32 < 5e-4, f"f32 path max abs err = {err32}"

    # Default bf16-MXU path: looser tolerance.
    out = jax.block_until_ready(
        cross_attention(q, kv, mask, wq, wkv, wproj, bproj,
                        num_heads=H, scale=scale))
    assert out.shape == (B, N, C)
    errbf = float(jnp.max(jnp.abs(out - ref)))
    assert errbf < 6e-2, f"bf16 path max abs err = {errbf}"

    print("KERNEL_OK")
</pallas_src>

<mosaic_0001>
module attributes {stable_mosaic.version = 11 : i64} {
  func.func @cross_attention_kernel(%arg0: i32, %arg1: memref<16x32xf32, #tpu.memory_space<vmem>>, %arg2: memref<16x32xf32, #tpu.memory_space<vmem>>, %arg3: memref<16x8x8xf32, #tpu.memory_space<vmem>>, %arg4: memref<32x32xf32, #tpu.memory_space<vmem>>, %arg5: memref<32x64xf32, #tpu.memory_space<vmem>>, %arg6: memref<32x32xf32, #tpu.memory_space<vmem>>, %arg7: memref<1x32xf32, #tpu.memory_space<vmem>>, %arg8: memref<16x32xf32, #tpu.memory_space<vmem>>) attributes {dimension_semantics = [#tpu.dimension_semantics<parallel>], iteration_bounds = array<i64: 1>, scalar_prefetch = 0 : i64, scratch_operands = 0 : i64, tpu.core_type = #tpu.core_type<tc>, window_params = [{transform_indices = @transform_0, window_bounds = array<i64: 16, 32>}, {transform_indices = @transform_1, window_bounds = array<i64: 16, 32>}, {transform_indices = @transform_2, window_bounds = array<i64: 16, 8, 8>}, {pipeline_mode = #tpu.pipeline_mode<synchronous>, transform_indices = @transform_3, window_bounds = array<i64: 32, 32>}, {pipeline_mode = #tpu.pipeline_mode<synchronous>, transform_indices = @transform_4, window_bounds = array<i64: 32, 64>}, {pipeline_mode = #tpu.pipeline_mode<synchronous>, transform_indices = @transform_5, window_bounds = array<i64: 32, 32>}, {pipeline_mode = #tpu.pipeline_mode<synchronous>, transform_indices = @transform_6, window_bounds = array<i64: 1, 32>}, {transform_indices = @transform_7, window_bounds = array<i64: 16, 32>}]} {
    %c0 = arith.constant 0 : index
    %c0_0 = arith.constant 0 : index
    %0 = vector.load %arg1[%c0, %c0_0] : memref<16x32xf32, #tpu.memory_space<vmem>>, vector<16x32xf32>
    %c0_1 = arith.constant 0 : index
    %c0_2 = arith.constant 0 : index
    %1 = vector.load %arg2[%c0_1, %c0_2] : memref<16x32xf32, #tpu.memory_space<vmem>>, vector<16x32xf32>
    %c0_3 = arith.constant 0 : index
    %c0_4 = arith.constant 0 : index
    %2 = vector.load %arg4[%c0_3, %c0_4] : memref<32x32xf32, #tpu.memory_space<vmem>>, vector<32x32xf32>
    %cst = arith.constant dense<0.000000e+00> : vector<16x32xf32>
    %3 = tpu.matmul %0, %2, %cst {dimension_numbers = #tpu.dot_dimension_numbers<[1], [0], [0], [1], [0, 0, 1, 1], [], []>} : vector<16x32xf32>, vector<32x32xf32>, vector<16x32xf32> -> vector<16x32xf32>
    %c0_5 = arith.constant 0 : index
    %c0_6 = arith.constant 0 : index
    %4 = vector.load %arg5[%c0_5, %c0_6] : memref<32x64xf32, #tpu.memory_space<vmem>>, vector<32x64xf32>
    %cst_7 = arith.constant dense<0.000000e+00> : vector<16x64xf32>
    %5 = tpu.matmul %1, %4, %cst_7 {dimension_numbers = #tpu.dot_dimension_numbers<[1], [0], [0], [1], [0, 0, 1, 1], [], []>} : vector<16x32xf32>, vector<32x64xf32>, vector<16x64xf32> -> vector<16x64xf32>
    %6 = vector.shape_cast %3 : vector<16x32xf32> to vector<2x8x8x4xf32>
    %7 = tpu.transpose %6, [0, 2, 1, 3] : vector<2x8x8x4xf32> -> vector<2x8x8x4xf32>
    %8 = vector.shape_cast %7 : vector<2x8x8x4xf32> to vector<16x8x4xf32>
    %9 = vector.extract_strided_slice %5 {offsets = [0, 0], sizes = [16, 32], strides = [1, 1]} : vector<16x64xf32> to vector<16x32xf32>
    %10 = vector.shape_cast %9 : vector<16x32xf32> to vector<2x8x8x4xf32>
    %11 = tpu.transpose %10, [0, 2, 1, 3] : vector<2x8x8x4xf32> -> vector<2x8x8x4xf32>
    %12 = vector.shape_cast %11 : vector<2x8x8x4xf32> to vector<16x8x4xf32>
    %13 = vector.extract_strided_slice %5 {offsets = [0, 32], sizes = [16, 32], strides = [1, 1]} : vector<16x64xf32> to vector<16x32xf32>
    %14 = vector.shape_cast %13 : vector<16x32xf32> to vector<2x8x8x4xf32>
    %15 = tpu.transpose %14, [0, 2, 1, 3] : vector<2x8x8x4xf32> -> vector<2x8x8x4xf32>
    %16 = vector.shape_cast %15 : vector<2x8x8x4xf32> to vector<16x8x4xf32>
    "tpu.trace_start"() <{level = 10 : i32, message = "gnd,gmd->gnm"}> : () -> ()
    %cst_8 = arith.constant dense<0.000000e+00> : vector<16x8x8xf32>
    %17 = tpu.matmul %8, %12, %cst_8 {dimension_numbers = #tpu.dot_dimension_numbers<[2], [2], [1], [1], [0, 0, 0, 1, 1, 1], [0], [0]>} : vector<16x8x4xf32>, vector<16x8x4xf32>, vector<16x8x8xf32> -> vector<16x8x8xf32>
    "tpu.trace_stop"() : () -> ()
    %c0_9 = arith.constant 0 : index
    %c0_10 = arith.constant 0 : index
    %c0_11 = arith.constant 0 : index
    %18 = vector.load %arg3[%c0_9, %c0_10, %c0_11] : memref<16x8x8xf32, #tpu.memory_space<vmem>>, vector<16x8x8xf32>
    %19 = arith.addf %17, %18 : vector<16x8x8xf32>
    %cst_12 = arith.constant dense<0xFF800000> : vector<16x8xf32>
    %20 = vector.multi_reduction <maximumf>, %19, %cst_12 [2] : vector<16x8x8xf32> to vector<16x8xf32>
    %21 = vector.shape_cast %20 : vector<16x8xf32> to vector<16x8x1xf32>
    %22 = vector.broadcast %21 : vector<16x8x1xf32> to vector<16x8x8xf32>
    %23 = arith.subf %19, %22 : vector<16x8x8xf32>
    %24 = math.exp %23 : vector<16x8x8xf32>
    %cst_13 = arith.constant dense<0.000000e+00> : vector<16x8xf32>
    %25 = vector.multi_reduction <add>, %24, %cst_13 [2] : vector<16x8x8xf32> to vector<16x8xf32>
    %26 = vector.shape_cast %25 : vector<16x8xf32> to vector<16x8x1xf32>
    "tpu.trace_start"() <{level = 10 : i32, message = "gnm,gmd->gnd"}> : () -> ()
    %cst_14 = arith.constant dense<0.000000e+00> : vector<16x8x4xf32>
    %27 = tpu.matmul %24, %16, %cst_14 {dimension_numbers = #tpu.dot_dimension_numbers<[2], [1], [1], [2], [0, 0, 0, 1, 1, 2], [0], [0]>} : vector<16x8x8xf32>, vector<16x8x4xf32>, vector<16x8x4xf32> -> vector<16x8x4xf32>
    "tpu.trace_stop"() : () -> ()
    %28 = tpu.reciprocal %26 : vector<16x8x1xf32> -> vector<16x8x1xf32>
    %29 = vector.broadcast %28 : vector<16x8x1xf32> to vector<16x8x4xf32>
    %30 = arith.mulf %27, %29 : vector<16x8x4xf32>
    %31 = vector.shape_cast %30 : vector<16x8x4xf32> to vector<2x8x8x4xf32>
    %32 = tpu.transpose %31, [0, 2, 1, 3] : vector<2x8x8x4xf32> -> vector<2x8x8x4xf32>
    %33 = vector.shape_cast %32 : vector<2x8x8x4xf32> to vector<16x32xf32>
    %c0_15 = arith.constant 0 : index
    %c0_16 = arith.constant 0 : index
    %34 = vector.load %arg6[%c0_15, %c0_16] : memref<32x32xf32, #tpu.memory_space<vmem>>, vector<32x32xf32>
    %cst_17 = arith.constant dense<0.000000e+00> : vector<16x32xf32>
    %35 = tpu.matmul %33, %34, %cst_17 {dimension_numbers = #tpu.dot_dimension_numbers<[1], [0], [0], [1], [0, 0, 1, 1], [], []>} : vector<16x32xf32>, vector<32x32xf32>, vector<16x32xf32> -> vector<16x32xf32>
    %c0_18 = arith.constant 0 : index
    %c0_19 = arith.constant 0 : index
    %36 = vector.load %arg7[%c0_18, %c0_19] : memref<1x32xf32, #tpu.memory_space<vmem>>, vector<1x32xf32>
    %37 = vector.broadcast %36 : vector<1x32xf32> to vector<16x32xf32>
    %38 = arith.addf %35, %37 : vector<16x32xf32>
    %c0_20 = arith.constant 0 : index
    %c0_21 = arith.constant 0 : index
    %39 = vector.load %arg8[%c0_20, %c0_21] : memref<16x32xf32, #tpu.memory_space<vmem>>, vector<16x32xf32>
    tpu.vector_store %arg8[%c0_20, %c0_21], %38 {strides = array<i32>} : memref<16x32xf32, #tpu.memory_space<vmem>>, vector<16x32xf32>,
    return
  }
  func.func @transform_0(%arg0: i32) -> (i32, i32) {
    %c0_i32 = arith.constant 0 : i32
    %c0_i32_0 = arith.constant 0 : i32
    return %arg0, %c0_i32 : i32, i32
  }
  func.func @transform_1(%arg0: i32) -> (i32, i32) {
    %c0_i32 = arith.constant 0 : i32
    %c0_i32_0 = arith.constant 0 : i32
    return %arg0, %c0_i32 : i32, i32
  }
  func.func @transform_2(%arg0: i32) -> (i32, i32, i32) {
    %c0_i32 = arith.constant 0 : i32
    %c0_i32_0 = arith.constant 0 : i32
    %c0_i32_1 = arith.constant 0 : i32
    return %arg0, %c0_i32, %c0_i32_0 : i32, i32, i32
  }
  func.func @transform_3(%arg0: i32) -> (i32, i32) {
    %c0_i32 = arith.constant 0 : i32
    %c0_i32_0 = arith.constant 0 : i32
    %c0_i32_1 = arith.constant 0 : i32
    return %c0_i32, %c0_i32_0 : i32, i32
  }
  func.func @transform_4(%arg0: i32) -> (i32, i32) {
    %c0_i32 = arith.constant 0 : i32
    %c0_i32_0 = arith.constant 0 : i32
    %c0_i32_1 = arith.constant 0 : i32
    return %c0_i32, %c0_i32_0 : i32, i32
  }
  func.func @transform_5(%arg0: i32) -> (i32, i32) {
    %c0_i32 = arith.constant 0 : i32
    %c0_i32_0 = arith.constant 0 : i32
    %c0_i32_1 = arith.constant 0 : i32
    return %c0_i32, %c0_i32_0 : i32, i32
  }
  func.func @transform_6(%arg0: i32) -> (i32, i32) {
    %c0_i32 = arith.constant 0 : i32
    %c0_i32_0 = arith.constant 0 : i32
    %c0_i32_1 = arith.constant 0 : i32
    return %c0_i32, %c0_i32_0 : i32, i32
  }
  func.func @transform_7(%arg0: i32) -> (i32, i32) {
    %c0_i32 = arith.constant 0 : i32
    %c0_i32_0 = arith.constant 0 : i32
    return %arg0, %c0_i32 : i32, i32
  }
}

</mosaic_0001>

<bundles_post_ra>
// kernel: tpu_custom_call.1
= control target key start
LH: loop header
LB: loop body
LE: loop exit
PB: predicated region body
PF: predicated region fallthrough
CT: control target
= control target key end

     0   :  { %s5373_s0 = inlined_call_operand.vmem [shape: f32[16,32], index: 0, kind: input, shape index: {}]   ;;  %s5374_s1 = inlined_call_operand.vmem [shape: f32[16,32], index: 1, kind: input, shape index: {}]   ;;  %s5375_s2 = inlined_call_operand.vmem [shape: f32[16,8,8], index: 2, kind: input, shape index: {}]   ;;  %s5376_s3 = inlined_call_operand.vmem [shape: f32[32,32], index: 3, kind: input, shape index: {}]   ;;  %s5377_s4 = inlined_call_operand.vmem [shape: f32[32,64], index: 4, kind: input, shape index: {}]   ;;  %s5378_s5 = inlined_call_operand.vmem [shape: f32[32,32], index: 5, kind: input, shape index: {}]   ;;  %s5379_s6 = inlined_call_operand.vmem [shape: f32[1,32], index: 6, kind: input, shape index: {}]   ;;  %s5380_s7 = inlined_call_operand.hbm [shape: f32[16,32], index: 7, kind: output, shape index: {}]  }
   0x1   :  { %v68_v0 = vld [vmem:[%s5377_s4 + $0x18] sm:$0xff]  ;;  %v67_v1 = vld [vmem:[%s5377_s4 + $0x10] sm:$0xff]  ;;  %v66_v3 = vld [vmem:[%s5377_s4 + $0x8] sm:$0xff] }
   0x2   :  { %87 = vmatpush.msra.mxu1 %v68_v0  ;;  %v34_v2 = vld [vmem:[%s5376_s3 + $0x18] sm:$0xff]  ;;  %v33_v4 = vld [vmem:[%s5376_s3 + $0x10] sm:$0xff]  ;;  %v32_v5 = vld [vmem:[%s5376_s3 + $0x8] sm:$0xff] }
   0x3   :  { %54 = vmatpush.msra.mxu0 %v34_v2  ;;  %v65_v6 = vld [vmem:[%s5377_s4] sm:$0xff] }
   0x4   :  { %88 = vmatpush.msra.mxu1 %v67_v1 }
   0x5   :  { %55 = vmatpush.msra.mxu0 %v33_v4 }
   0x6   :  { %12 = vsyncpa [#allocation3], 0  ;;  %89 = vmatpush.msra.mxu1 %v66_v3  ;;  %v29_v7 = vld [vmem:[%s5374_s1] sm:$0xff]  ;;  %vm35_vm0 = vcmask 261120   ;;  %v30_v10 = vld [vmem:[%s5374_s1 + $0x8] sm:$0xff]  ;;  %s3550_s24 = smov 112  }
   0x7   :  { %v31_v8 = vld [vmem:[%s5376_s3] sm:$0xff]  ;;  %56 = vmatpush.msra.mxu0 %v32_v5  ;;  %v28_v11 = vld [vmem:[%s5373_s0 + $0x8] sm:$0xff]  ;;  %s3549_s3 = smov 108   ;;  %s3551_s25 = smov 124   ;;  %v3556_v23 = vmov 1983009808  }
   0x8   :  { %v27_v9 = vld [vmem:[%s5373_s0] sm:$0xff]  ;;  %90 = vmatpush.msra.mxu1 %v65_v6  ;;  %s3552_s1 = smov 104   ;;  %s3553_s0 = smov 116   ;;  %v148_v24 = vunpack.c.l.s4 %v3556_v23  ;;  %vm143_vm1 = vcmask 1047556   ;;  %v3558_v39 = vmov 1934713408  }
   0x9   :  { %3347 = vmatmul.msk.f32.vlgmr.msra.gmra.mxu1 %vm35_vm0, %v29_v7  ;;  %57 = vmatpush.msra.mxu0 %v31_v8  ;;  %s3554_s26 = smov 120   ;;  %s3555_s27 = smov 100   ;;  %v196_v40 = vunpack.c.l.s4 %v3558_v39  ;;  %vm1595_vm2 = vcmask 31744   ;;  %vm2012_vm3 = vcmask 64512  }
   0xa   :  { %3345 = vmatmul.msk.f32.vlgmr.msra.gmra.mxu0 %vm35_vm0, %v27_v9  ;;  %s3557_s28 = smov 96   ;;  %v3698_v26 = vunpack.c.0.s8 %v148_v24  ;;  %s3560_s11 = smov 12  }
   0xb   :  { %v3715_v51 = vunpack.c.0.s8 %v196_v40  ;;  %s3561_s12 = smov 8   ;;  %s3562_s13 = smov 16  }
   0xc   :  { %s3563_s14 = smov 20   ;;  %s3564_s15 = smov 24  }
   0xd   :  { %s3565_s16 = smov 28  }
  0x11   :  { %3348 = vmatmul.msk.f32.gmra.mxu1 %vm35_vm0, %v30_v10 }
  0x12   :  { %3346 = vmatmul.msk.f32.gmra.mxu0 %vm35_vm0, %v28_v11 }
  0x86   :  { %v3648_v12 = vpop.f32.mrf.mxu1 }
  0x87   :  { %617 = vrot.lane.b32.xlu2 %v3648_v12, %s3549_s3  ;;  %611 = vrot.lane.b32.xlu1 %v3648_v12, %s3550_s24  ;;  %v3657_v13 = vpop.f32.mrf.mxu0  ;;  %v637_v28 = vrot.slane %v3648_v12, 4 }
  0x88   :  { %593 = vrot.lane.b32.xlu0 %v3648_v12, %s3551_s25  ;;  %v145_v62 = vrot.slane %v3657_v13, 4 }
  0x8e   :  { %v3666_v14 = vpop.f32.mrf.mxu1 }
  0x8f   :  { %623 = vrot.lane.b32.xlu2 %v3648_v12, %s3552_s1  ;;  %605 = vrot.lane.b32.xlu1 %v3648_v12, %s3553_s0  ;;  %v3674_v15 = vpop.f32.mrf.mxu0 }
  0x90   :  { %599 = vrot.lane.b32.xlu0 %v3648_v12, %s3554_s26 }
  0x97   :  { %118 = vrot.lane.b32.xlu2 %v3657_v13, %s3550_s24  ;;  %106 = vrot.lane.b32.xlu1 %v3657_v13, %s3554_s26 }
  0x98   :  { %100 = vrot.lane.b32.xlu0 %v3657_v13, %s3551_s25 }
  0x9f   :  { %124 = vrot.lane.b32.xlu2 %v3657_v13, %s3549_s3  ;;  %112 = vrot.lane.b32.xlu1 %v3657_v13, %s3553_s0 }
  0xa0   :  { %629 = vrot.lane.b32.xlu0 %v3648_v12, %s3555_s27 }
  0xa7   :  { %595 = vrot.lane.b32.xlu2 %v3666_v14, %s3551_s25  ;;  %136 = vrot.lane.b32.xlu1 %v3657_v13, %s3555_s27 }
  0xa8   :  { %130 = vrot.lane.b32.xlu0 %v3657_v13, %s3552_s1 }
  0xaf   :  { %607 = vrot.lane.b32.xlu2 %v3666_v14, %s3553_s0  ;;  %613 = vrot.lane.b32.xlu1 %v3666_v14, %s3550_s24 }
  0xb0   :  { %601 = vrot.lane.b32.xlu0 %v3666_v14, %s3554_s26 }
  0xb7   :  { %625 = vrot.lane.b32.xlu1 %v3666_v14, %s3552_s1  ;;  %102 = vrot.lane.b32.xlu2 %v3674_v15, %s3551_s25 }
  0xb8   :  { %619 = vrot.lane.b32.xlu0 %v3666_v14, %s3549_s3 }
  0xbf   :  { %120 = vrot.lane.b32.xlu1 %v3674_v15, %s3550_s24  ;;  %631 = vrot.lane.b32.xlu2 %v3666_v14, %s3555_s27 }
  0xc0   :  { %108 = vrot.lane.b32.xlu0 %v3674_v15, %s3554_s26 }
  0xc7   :  { %126 = vrot.lane.b32.xlu1 %v3674_v15, %s3549_s3  ;;  %132 = vrot.lane.b32.xlu2 %v3674_v15, %s3552_s1  ;;  %s3333_s1 = sshll.u32 %s5380_s7, 4  ;;  %s3334_s1 = int_to_ptr.hbm [resolvable:$true] %s3333_s1 }
  0xc8   :  { %114 = vrot.lane.b32.xlu0 %v3674_v15, %s3553_s0  ;;  %s3566_s0 = smov [#allocation2]  }
  0xc9   :  { %s3331_s26 = sshll.u32 %s3566_s0, 4  ;;  %s3332_s26 = int_to_ptr.vmem [resolvable:$true] %s3331_s26 }
  0xd0   :  { %138 = vrot.lane.b32.xlu0 %v3674_v15, %s3555_s27  ;;  %s3567_s27 = smov 128  }
  0xe1   :  { %v3688_v16 = vpop.permute.xlu2 %617 }
  0xe2   :  { %v673_v11 = vrot.slane %v3688_v16, 4 }
  0xe9   :  { %v3690_v17 = vpop.permute.xlu2 %623 }
  0xea   :  { %v659_v46 = vrot.slane %v3690_v17, 4 }
  0xf1   :  { %v3692_v18 = vpop.permute.xlu2 %118 }
  0xf9   :  { %v612_v19 = vpop.permute.xlu1 %611  ;;  %v3694_v20 = vpop.permute.xlu2 %124 }
  0xfa   :  { %v594_v21 = vpop.permute.xlu0 %593  ;;  %v661_v42 = vrot.slane %v612_v19, 4  ;;  %v660_v50 = vsel %vm143_vm1, %v659_v46, %v612_v19  ;;  %v181_v24 = vrot.slane %v3694_v20, 4 }
  0xfb   :  { %v3418_v22 = vpack.i.bf16 %v594_v21, %v3648_v12  ;;  %v649_v25 = vrot.slane %v594_v21, 4  ;;  %v3728_v0 = vperm.slane %v660_v50, %v3698_v26 }
  0xfc   :  { %v662_v53 = vsel %vm143_vm1, %v3690_v17, %v661_v42 }
  0xfd   :  { %3419 = vrot.lane.b32.xlu1 %v3418_v22, %s3557_s28  ;;  %v670_v3 = vperm.slane %v662_v53, %v3698_v26  ;;  %v169_v22 = vrot.slane %v3692_v18, 4  ;;  %v709_v23 = vrot.slane %v3728_v0, 4 }
 0x101   :  { %v606_v27 = vpop.permute.xlu1 %605  ;;  %v596_v29 = vpop.permute.xlu2 %595 }
 0x102   :  { %v647_v30 = vrot.slane %v606_v27, 4  ;;  %v3428_v31 = vpack.i.bf16 %v3688_v16, %v606_v27  ;;  %v650_v32 = vsel %vm143_vm1, %v606_v27, %v649_v25  ;;  %v600_v33 = vpop.permute.xlu0 %599  ;;  %v761_v56 = vrot.slane %v596_v29, 4 }
 0x103   :  { %v658_v34 = vperm.slane %v650_v32, %v3698_v26  ;;  %v635_v35 = vrot.slane %v600_v33, 4  ;;  %v3423_v36 = vpack.i.bf16 %v612_v19, %v600_v33  ;;  %v638_v37 = vsel %vm143_vm1, %v600_v33, %v637_v28 }
 0x104   :  { %v648_v38 = vsel %vm143_vm1, %v647_v30, %v594_v21  ;;  %v646_v41 = vperm.slane %v638_v37, %v3698_v26  ;;  %3429 = vrot.lane.b32.xlu0 %v3428_v31, %s3557_s28  ;;  %v3438_v61 = vpack.i.bf16 %v596_v29, %v3666_v14  ;;  %v749_v19 = vrot.slane %v3666_v14, 4 }
 0x105   :  { %v654_v43 = vperm.slane %v648_v38, %v3698_v26  ;;  %v695_v44 = vrot.slane %v658_v34, 4  ;;  %v636_v45 = vsel %vm143_vm1, %v635_v35, %v3648_v12  ;;  %3424 = vrot.lane.b32.xlu2 %v3423_v36, %s3557_s28  ;;  %v257_v21 = vrot.slane %v3674_v15, 4 }
 0x106   :  { %v642_v47 = vperm.slane %v636_v45, %v3698_v26  ;;  %v697_v48 = vrot.slane %v646_v41, 4  ;;  %v721_v27 = vrot.slane %v670_v3, 4 }
 0x107   :  { %v683_v49 = vrot.slane %v654_v43, 4  ;;  %v696_v54 = vsel %vm143_vm1, %v695_v44, %v646_v41 }
 0x108   :  { %v685_v52 = vrot.slane %v642_v47, 4  ;;  %v698_v55 = vsel %vm143_vm1, %v658_v34, %v697_v48  ;;  %v3733_v4 = vperm.slane %v696_v54, %v3715_v51 }
 0x109   :  { %v3721_v57 = vpop.permute.xlu2 %607  ;;  %v107_v58 = vpop.permute.xlu1 %106  ;;  %v684_v59 = vsel %vm143_vm1, %v683_v49, %v642_v47  ;;  %v3736_v5 = vperm.slane %v698_v55, %v3715_v51 }
 0x10a   :  { %v686_v60 = vsel %vm143_vm1, %v654_v43, %v685_v52  ;;  %v101_v63 = vpop.permute.xlu0 %100  ;;  %v759_v1 = vrot.slane %v3721_v57, 4  ;;  %v142_v2 = vrot.slane %v107_v58, 4  ;;  %v146_v6 = vsel %vm143_vm1, %v107_v58, %v145_v62 }
 0x10b   :  { %v3741_v7 = vperm.slane %v684_v59, %v3715_v51  ;;  %v3744_v8 = vperm.slane %v686_v60, %v3715_v51  ;;  %v762_v9 = vsel %vm143_vm1, %v3721_v57, %v761_v56  ;;  %v154_v12 = vperm.slane %v146_v6, %v3698_v26 }
 0x10c   :  { %3439 = vrot.lane.b32.xlu0 %v3438_v61, %s3557_s28  ;;  %v144_v10 = vsel %vm143_vm1, %v142_v2, %v3657_v13  ;;  %v760_v25 = vsel %vm143_vm1, %v759_v1, %v596_v29  ;;  %v3759_v28 = vperm.slane %v762_v9, %v3698_v26  ;;  %v157_v30 = vrot.slane %v101_v63, 4 }
 0x10d   :  { %v150_v13 = vperm.slane %v144_v10, %v3698_v26  ;;  %v733_v31 = vrot.slane %v3741_v7, 4  ;;  %v737_v32 = vrot.slane %v3744_v8, 4  ;;  %v741_v33 = vrot.slane %v3733_v4, 4 }
 0x10e   :  { %v745_v34 = vrot.slane %v3736_v5, 4  ;;  %v3769_v29 = vperm.slane %v760_v25, %v3698_v26  ;;  %v205_v37 = vrot.slane %v154_v12, 4  ;;  %v807_v45 = vrot.slane %v3759_v28, 4 }
 0x10f   :  { %v193_v46 = vrot.slane %v150_v13, 4 }
 0x110   :  { %v795_v62 = vrot.slane %v3769_v29, 4 }
 0x111   :  { %v113_v35 = vpop.permute.xlu1 %112  ;;  %v3766_v36 = vpop.permute.xlu2 %102 }
 0x112   :  { %v155_v38 = vrot.slane %v113_v35, 4  ;;  %v158_v39 = vsel %vm143_vm1, %v113_v35, %v157_v30  ;;  %v630_v40 = vpop.permute.xlu0 %629 }
 0x113   :  { %v166_v41 = vperm.slane %v158_v39, %v3698_v26  ;;  %v671_v42 = vrot.slane %v630_v40, 4  ;;  %v674_v43 = vsel %vm143_vm1, %v630_v40, %v673_v11  ;;  %v3433_v44 = vpack.i.bf16 %v630_v40, %v3690_v17 }
 0x114   :  { %v156_v47 = vsel %vm143_vm1, %v155_v38, %v101_v63  ;;  %v682_v48 = vperm.slane %v674_v43, %v3698_v26 }
 0x115   :  { %v162_v49 = vperm.slane %v156_v47, %v3698_v26  ;;  %v203_v50 = vrot.slane %v166_v41, 4  ;;  %v206_v52 = vsel %vm143_vm1, %v166_v41, %v205_v37  ;;  %v672_v53 = vsel %vm143_vm1, %v671_v42, %v3688_v16  ;;  %3434 = vrot.lane.b32.xlu1 %v3433_v44, %s3557_s28 }
 0x116   :  { %v3784_v54 = vperm.slane %v206_v52, %v3715_v51  ;;  %v678_v17 = vperm.slane %v672_v53, %v3698_v26  ;;  %v719_v55 = vrot.slane %v682_v48, 4  ;;  %v722_v56 = vsel %vm143_vm1, %v682_v48, %v721_v27 }
 0x117   :  { %v191_v58 = vrot.slane %v162_v49, 4  ;;  %v194_v59 = vsel %vm143_vm1, %v162_v49, %v193_v46  ;;  %v204_v60 = vsel %vm143_vm1, %v203_v50, %v154_v12  ;;  %v730_v61 = vperm.slane %v722_v56, %v3715_v51 }
 0x118   :  { %v3793_v16 = vperm.slane %v194_v59, %v3715_v51  ;;  %v3796_v63 = vperm.slane %v204_v60, %v3715_v51  ;;  %v707_v1 = vrot.slane %v678_v17, 4  ;;  %v710_v6 = vsel %vm143_vm1, %v678_v17, %v709_v23 }
 0x119   :  { %v192_v2 = vsel %vm143_vm1, %v191_v58, %v150_v13  ;;  %v720_v9 = vsel %vm143_vm1, %v719_v55, %v670_v3  ;;  %v743_v10 = vrot.slane %v730_v61, 4  ;;  %v137_v11 = vpop.permute.xlu1 %136  ;;  %v3801_v12 = vpop.permute.xlu2 %631  ;;  %v253_v27 = vrot.slane %v3784_v54, 4 }
 0x11a   :  { %v3804_v25 = vperm.slane %v192_v2, %v3715_v51  ;;  %v708_v30 = vsel %vm143_vm1, %v707_v1, %v3728_v0  ;;  %v131_v37 = vpop.permute.xlu0 %130  ;;  %v245_v13 = vrot.slane %v3793_v16, 4  ;;  %v3812_v23 = vperm.slane %v710_v6, %v3715_v51 }
 0x11b   :  { %v3815_v3 = vperm.slane %v720_v9, %v3715_v51  ;;  %v3819_v38 = vsel %vm143_vm1, %v743_v10, %v3736_v5  ;;  %v249_v39 = vrot.slane %v3796_v63, 4  ;;  %v714_v40 = vperm.slane %v708_v30, %v3715_v51 }
 0x11c   :  { %v3824_v0 = vsel %vm143_vm1, %v730_v61, %v745_v34  ;;  %v179_v41 = vrot.slane %v137_v11, 4  ;;  %v241_v42 = vrot.slane %v3804_v25, 4  ;;  %v735_v43 = vrot.slane %v3812_v23, 4 }
 0x11d   :  { %v3830_v44 = vsel %vm143_vm1, %v3815_v3, %v741_v33  ;;  %v883_v46 = vrot.slane %v3819_v38, 4  ;;  %v739_v5 = vrot.slane %v3815_v3, 4  ;;  %v182_v34 = vsel %vm143_vm1, %v137_v11, %v181_v24 }
 0x11e   :  { %v180_v47 = vsel %vm143_vm1, %v179_v41, %v3694_v20  ;;  %v167_v48 = vrot.slane %v131_v37, 4  ;;  %v895_v49 = vrot.slane %v3824_v0, 4  ;;  %v190_v52 = vperm.slane %v182_v34, %v3698_v26 }
 0x11f   :  { %v186_v50 = vperm.slane %v180_v47, %v3698_v26  ;;  %v170_v33 = vsel %vm143_vm1, %v131_v37, %v169_v22  ;;  %v897_v53 = vrot.slane %v3830_v44, 4  ;;  %v783_v24 = vrot.slane %v3801_v12, 4 }
 0x120   :  { %v168_v17 = vsel %vm143_vm1, %v167_v48, %v3692_v18  ;;  %v178_v20 = vperm.slane %v170_v33, %v3698_v26  ;;  %v227_v56 = vrot.slane %v190_v52, 4  ;;  %v731_v60 = vrot.slane %v714_v40, 4 }
 0x121   :  { %v215_v55 = vrot.slane %v186_v50, 4  ;;  %v174_v58 = vperm.slane %v168_v17, %v3698_v26  ;;  %v3851_v59 = vpop.permute.xlu1 %613  ;;  %v3854_v2 = vpop.permute.xlu2 %132  ;;  %v3859_v18 = vsel %vm143_vm1, %v714_v40, %v733_v31  ;;  %v3863_v6 = vsel %vm143_vm1, %v735_v43, %v3744_v8 }
 0x122   :  { %v229_v61 = vrot.slane %v178_v20, 4  ;;  %v773_v1 = vrot.slane %v3851_v59, 4  ;;  %v602_v22 = vpop.permute.xlu0 %601  ;;  %v228_v11 = vsel %vm143_vm1, %v227_v56, %v178_v20  ;;  %v279_v48 = vrot.slane %v3854_v2, 4 }
 0x123   :  { %v216_v9 = vsel %vm143_vm1, %v215_v55, %v174_v58  ;;  %v217_v10 = vrot.slane %v174_v58, 4  ;;  %v747_v30 = vrot.slane %v602_v22, 4  ;;  %v234_v47 = vperm.slane %v228_v11, %v3715_v51 }
 0x124   :  { %v3868_v37 = vperm.slane %v216_v9, %v3715_v51  ;;  %v230_v41 = vsel %vm143_vm1, %v190_v52, %v229_v61  ;;  %v750_v31 = vsel %vm143_vm1, %v602_v22, %v749_v19  ;;  %v859_v8 = vrot.slane %v3863_v6, 4 }
 0x125   :  { %v218_v40 = vsel %vm143_vm1, %v186_v50, %v217_v10  ;;  %v238_v43 = vperm.slane %v230_v41, %v3715_v51  ;;  %v748_v34 = vsel %vm143_vm1, %v747_v30, %v3666_v14  ;;  %v247_v17 = vrot.slane %v234_v47, 4 }
 0x126   :  { %v3881_v33 = vperm.slane %v218_v40, %v3715_v51  ;;  %v3884_v52 = vsel %vm143_vm1, %v234_v47, %v249_v39  ;;  %v758_v20 = vperm.slane %v750_v31, %v3698_v26  ;;  %v754_v50 = vperm.slane %v748_v34, %v3698_v26 }
 0x127   :  { %v251_v55 = vrot.slane %v238_v43, 4  ;;  %v3888_v19 = vsel %vm143_vm1, %v238_v43, %v253_v27  ;;  %v732_v14 = vsel %vm143_vm1, %v731_v60, %v3741_v7  ;;  %v239_v56 = vrot.slane %v3868_v37, 4 }
 0x128   :  { %v243_v58 = vrot.slane %v3881_v33, 4  ;;  %v3897_v61 = vsel %vm143_vm1, %v247_v17, %v3796_v63  ;;  %v405_v39 = vrot.slane %v3884_v52, 4  ;;  %v403_v27 = vrot.slane %v3888_v19, 4 }
 0x129   :  { %v3902_v9 = vsel %vm143_vm1, %v251_v55, %v3784_v54  ;;  %v796_v7 = vsel %vm143_vm1, %v795_v62, %v754_v50  ;;  %v797_v60 = vrot.slane %v754_v50, 4  ;;  %v3912_v10 = vsel %vm143_vm1, %v3881_v33, %v245_v13 }
 0x12a   :  { %v393_v63 = vrot.slane %v3897_v61, 4  ;;  %v3916_v11 = vperm.slane %v796_v7, %v3715_v51  ;;  %v808_v54 = vsel %vm143_vm1, %v807_v45, %v758_v20  ;;  %v809_v62 = vrot.slane %v758_v20, 4 }
 0x12b   :  { %v798_v30 = vsel %vm143_vm1, %v3769_v29, %v797_v60  ;;  %v3924_v41 = vperm.slane %v808_v54, %v3715_v51  ;;  %v3443_v47 = vpack.i.bf16 %v3851_v59, %v602_v22  ;;  %v391_v13 = vrot.slane %v3902_v9, 4 }
 0x12c   :  { %v3929_v31 = vperm.slane %v798_v30, %v3715_v51  ;;  %v738_v40 = vsel %vm143_vm1, %v3812_v23, %v737_v32  ;;  %v740_v29 = vsel %vm143_vm1, %v739_v5, %v3733_v4  ;;  %v3941_v45 = vsel %vm143_vm1, %v403_v27, %v3884_v52  ;;  %v3952_v5 = vpop.permute.xlu1 %625 }
 0x12d   :  { %v810_v22 = vsel %vm143_vm1, %v3759_v28, %v809_v62  ;;  %v845_v43 = vrot.slane %v3916_v11, 4  ;;  %3444 = vrot.lane.b32.xlu0 %v3443_v47, %s3557_s28  ;;  %v853_v23 = vrot.slane %v3924_v41, 4  ;;  %v861_v3 = vrot.slane %v732_v14, 4 }
 0x12e   :  { %v3949_v32 = vperm.slane %v810_v22, %v3715_v51  ;;  %v871_v4 = vrot.slane %v738_v40, 4  ;;  %v849_v34 = vrot.slane %v3929_v31, 4  ;;  %v860_v17 = vsel %vm143_vm1, %v859_v8, %v732_v14 }
 0x12f   :  { %v884_v28 = vsel %vm143_vm1, %v883_v46, %v740_v29  ;;  %v896_v20 = vsel %vm143_vm1, %v895_v49, %v3830_v44  ;;  %v866_v55 = vperm.slane %v860_v17, %v3698_v26  ;;  %v873_v27 = vrot.slane %v3859_v18, 4 }
 0x130   :  { %v872_v50 = vsel %vm143_vm1, %v871_v4, %v3859_v18  ;;  %v890_v7 = vperm.slane %v884_v28, %v3698_v26  ;;  %v885_v60 = vrot.slane %v740_v29, 4  ;;  %v902_v54 = vperm.slane %v896_v20, %v3698_v26 }
 0x131   :  { %v878_v14 = vperm.slane %v872_v50, %v3698_v26  ;;  %v771_v46 = vrot.slane %v3952_v5, 4  ;;  %v857_v30 = vrot.slane %v3949_v32, 4  ;;  %v909_v62 = vrot.slane %v866_v55, 4 }
 0x132   :  { %v933_v49 = vrot.slane %v890_v7, 4  ;;  %v774_v47 = vsel %vm143_vm1, %v3952_v5, %v773_v1  ;;  %v931_v18 = vrot.slane %v902_v54, 4  ;;  %v862_v20 = vsel %vm143_vm1, %v3863_v6, %v861_v3 }
 0x133   :  { %v907_v22 = vrot.slane %v878_v14, 4  ;;  %v772_v8 = vsel %vm143_vm1, %v771_v46, %v3851_v59  ;;  %v782_v29 = vperm.slane %v774_v47, %v3698_v26  ;;  %v910_v4 = vsel %vm143_vm1, %v878_v14, %v909_v62  ;;  %v620_v62 = vpop.permute.xlu0 %619 }
 0x134   :  { %v934_v17 = vsel %vm143_vm1, %v902_v54, %v933_v49  ;;  %v778_v28 = vperm.slane %v772_v8, %v3698_v26  ;;  %v932_v1 = vsel %vm143_vm1, %v931_v18, %v890_v7  ;;  %v3987_v35 = vperm.slane %v910_v4, %v3715_v51 }
 0x135   :  { %v908_v50 = vsel %vm143_vm1, %v907_v22, %v866_v55  ;;  %v3990_v59 = vperm.slane %v934_v17, %v3715_v51  ;;  %v938_v14 = vperm.slane %v932_v1, %v3715_v51  ;;  %v833_v6 = vrot.slane %v782_v29, 4 }
 0x136   :  { %v914_v46 = vperm.slane %v908_v50, %v3715_v51  ;;  %v821_v54 = vrot.slane %v778_v28, 4  ;;  %v870_v3 = vperm.slane %v862_v20, %v3698_v26  ;;  %v874_v55 = vsel %vm143_vm1, %v738_v40, %v873_v27 }
 0x137   :  { %v959_v49 = vrot.slane %v3990_v59, 4  ;;  %v955_v7 = vrot.slane %v938_v14, 4  ;;  %v882_v22 = vperm.slane %v874_v55, %v3698_v26  ;;  %v886_v18 = vsel %vm143_vm1, %v3819_v38, %v885_v60 }
 0x138   :  { %v957_v47 = vrot.slane %v914_v46, 4  ;;  %v894_v4 = vperm.slane %v886_v18, %v3698_v26  ;;  %v898_v17 = vsel %vm143_vm1, %v3824_v0, %v897_v53  ;;  %v785_v20 = vrot.slane %v620_v62, 4 }
 0x139   :  { %v960_v8 = vsel %vm143_vm1, %v959_v49, %v3987_v35  ;;  %v956_v40 = vsel %vm143_vm1, %v955_v7, %v914_v46  ;;  %v906_v50 = vperm.slane %v898_v17, %v3698_v26  ;;  %v919_v38 = vrot.slane %v882_v22, 4 }
 0x13a   :  { %v958_v27 = vsel %vm143_vm1, %v938_v14, %v957_v47  ;;  %3353 = vmatpush.xpose.msk.msra.mxu2 %vm1595_vm2, %v960_v8  ;;  %3349 = vmatpush.xpose.msk.msra.mxu3 %vm1595_vm2, %v956_v40  ;;  %v3448_v60 = vpack.i.bf16 %v620_v62, %v3721_v57  ;;  %v784_v44 = vsel %vm143_vm1, %v783_v24, %v620_v62  ;;  %v921_v53 = vrot.slane %v870_v3, 4 }
 0x13b   :  { %v786_v0 = vsel %vm143_vm1, %v3801_v12, %v785_v20  ;;  %v920_v1 = vsel %vm143_vm1, %v919_v38, %v870_v3  ;;  %v943_v46 = vrot.slane %v906_v50, 4  ;;  %v790_v14 = vperm.slane %v784_v44, %v3698_v26 }
 0x13c   :  { %v794_v49 = vperm.slane %v786_v0, %v3698_v26  ;;  %v961_v55 = vrot.slane %v3987_v35, 4  ;;  %v3453_v57 = vpack.i.bf16 %v3801_v12, %v3952_v5  ;;  %v4026_v24 = vperm.slane %v920_v1, %v3715_v51  ;;  %3449 = vrot.lane.b32.xlu0 %v3448_v60, %s3557_s28 }
 0x13d   :  { %v945_v62 = vrot.slane %v894_v4, 4  ;;  %v944_v7 = vsel %vm143_vm1, %v943_v46, %v894_v4  ;;  %v819_v47 = vrot.slane %v790_v14, 4  ;;  %v822_v3 = vsel %vm143_vm1, %v790_v14, %v821_v54 }
 0x13e   :  { %3351 = vmatpush.xpose.msk.msrb.mxu3 %vm1595_vm2, %v958_v27  ;;  %v831_v18 = vrot.slane %v794_v49, 4  ;;  %v4032_v8 = vperm.slane %v944_v7, %v3715_v51  ;;  %v830_v17 = vperm.slane %v822_v3, %v3715_v51  ;;  %v834_v20 = vsel %vm143_vm1, %v794_v49, %v833_v6 }
 0x13f   :  { %v922_v12 = vsel %vm143_vm1, %v882_v22, %v921_v53  ;;  %v820_v5 = vsel %vm143_vm1, %v819_v47, %v778_v28  ;;  %v842_v27 = vperm.slane %v834_v20, %v3715_v51  ;;  %v4044_v54 = vsel %vm143_vm1, %v239_v56, %v3804_v25  ;;  %v109_v25 = vpop.permute.xlu0 %108 }
 0x140   :  { %v832_v40 = vsel %vm143_vm1, %v831_v18, %v782_v29  ;;  %v963_v4 = vrot.slane %v4032_v8, 4  ;;  %v826_v38 = vperm.slane %v820_v5, %v3715_v51  ;;  %v847_v22 = vrot.slane %v830_v17, 4 }
 0x141   :  { %v4049_v6 = vperm.slane %v832_v40, %v3715_v51  ;;  %v4054_v29 = vsel %vm143_vm1, %v830_v17, %v849_v34  ;;  %v855_v28 = vrot.slane %v842_v27, 4  ;;  %v930_v60 = vperm.slane %v922_v12, %v3715_v51 }
 0x142   :  { %v946_v44 = vsel %vm143_vm1, %v906_v50, %v945_v62  ;;  %v964_v56 = vsel %vm143_vm1, %v963_v4, %v4026_v24  ;;  %v843_v0 = vrot.slane %v826_v38, 4  ;;  %v4063_v53 = vsel %vm143_vm1, %v826_v38, %v845_v43 }
 0x143   :  { %v4067_v1 = vsel %vm143_vm1, %v847_v22, %v3929_v31  ;;  %v965_v34 = vrot.slane %v4026_v24, 4  ;;  %3357 = vmatpush.xpose.msk.msrb.mxu2 %vm1595_vm2, %v964_v56  ;;  %v4075_v50 = vsel %vm143_vm1, %v4049_v6, %v853_v23  ;;  %v4079_v46 = vsel %vm143_vm1, %v855_v28, %v3949_v32 }
 0x144   :  { %v4084_v43 = vsel %vm143_vm1, %v842_v27, %v857_v30  ;;  %v4088_v31 = vsel %vm143_vm1, %v843_v0, %v3916_v11  ;;  %v851_v14 = vrot.slane %v4049_v6, 4  ;;  %v971_v49 = vrot.slane %v4067_v1, 4  ;;  %3454 = vrot.lane.b32.xlu0 %v3453_v57, %s3557_s28 }
 0x145   :  { %v983_v23 = vrot.slane %v4054_v29, 4  ;;  %v973_v62 = vrot.slane %v4088_v31, 4  ;;  %v985_v7 = vrot.slane %v4063_v53, 4  ;;  %v995_v32 = vrot.slane %v4079_v46, 4 }
 0x146   :  { %v954_v30 = vperm.slane %v946_v44, %v3715_v51  ;;  %v1007_v47 = vrot.slane %v4084_v43, 4  ;;  %v1009_v11 = vrot.slane %v4075_v50, 4  ;;  %v969_v3 = vrot.slane %v930_v60, 4 }
 0x147   :  { %v244_v18 = vsel %vm143_vm1, %v243_v58, %v3793_v16  ;;  %v242_v57 = vsel %vm143_vm1, %v3868_v37, %v241_v42  ;;  %v379_v12 = vrot.slane %v3912_v10, 4  ;;  %v369_v40 = vrot.slane %v4044_v54, 4  ;;  %v121_v58 = vpop.permute.xlu1 %120 }
 0x148   :  { %v967_v17 = vrot.slane %v954_v30, 4  ;;  %v367_v20 = vrot.slane %v244_v18, 4  ;;  %v970_v5 = vsel %vm143_vm1, %v954_v30, %v969_v3  ;;  %v392_v33 = vsel %vm143_vm1, %v391_v13, %v3897_v61 }
 0x149   :  { %v410_v16 = vperm.slane %v3941_v45, %v3698_v26  ;;  %3363 = vmatpush.xpose.msk.msrb.mxu1 %vm1595_vm2, %v970_v5  ;;  %v380_v37 = vsel %vm143_vm1, %v379_v12, %v242_v57  ;;  %v398_v4 = vperm.slane %v392_v33, %v3698_v26  ;;  %v381_v38 = vrot.slane %v242_v57, 4 }
 0x14a   :  { %v968_v27 = vsel %vm143_vm1, %v967_v17, %v930_v60  ;;  %v368_v42 = vsel %vm143_vm1, %v367_v20, %v4044_v54  ;;  %v386_v45 = vperm.slane %v380_v37, %v3698_v26  ;;  %v280_v28 = vsel %vm143_vm1, %v279_v48, %v121_v58 }
 0x14b   :  { %3361 = vmatpush.xpose.msk.msrb.mxu0 %vm1595_vm2, %v968_v27  ;;  %v374_v13 = vperm.slane %v368_v42, %v3698_v26  ;;  %v439_v22 = vrot.slane %v410_v16, 4  ;;  %v281_v60 = vrot.slane %v121_v58, 4  ;;  %v255_v44 = vrot.slane %v109_v25, 4 }
 0x14c   :  { %v258_v54 = vsel %vm143_vm1, %v109_v25, %v257_v21  ;;  %v415_v56 = vrot.slane %v386_v45, 4  ;;  %v4134_v30 = vperm.slane %v280_v28, %v3698_v26  ;;  %v4146_v21 = vsel %vm143_vm1, %v4054_v29, %v985_v7 }
 0x14d   :  { %v440_v0 = vsel %vm143_vm1, %v439_v22, %v398_v4  ;;  %v4137_v3 = vperm.slane %v258_v54, %v3698_v26  ;;  %v282_v48 = vsel %vm143_vm1, %v3854_v2, %v281_v60  ;;  %v256_v57 = vsel %vm143_vm1, %v255_v44, %v3674_v15  ;;  %v115_v60 = vpop.permute.xlu0 %114 }
 0x14e   :  { %v446_v17 = vperm.slane %v440_v0, %v3715_v51  ;;  %v417_v20 = vrot.slane %v374_v13, 4  ;;  %v416_v12 = vsel %vm143_vm1, %v415_v56, %v374_v13  ;;  %v962_v5 = vsel %vm143_vm1, %v3990_v59, %v961_v55 }
 0x14f   :  { %v4154_v33 = vperm.slane %v282_v48, %v3698_v26  ;;  %v422_v2 = vperm.slane %v416_v12, %v3715_v51  ;;  %v262_v15 = vperm.slane %v256_v57, %v3698_v26  ;;  %v329_v7 = vrot.slane %v4134_v30, 4 }
 0x150   :  { %v463_v58 = vrot.slane %v446_v17, 4  ;;  %v418_v25 = vsel %vm143_vm1, %v386_v45, %v417_v20  ;;  %v317_v27 = vrot.slane %v4137_v3, 4  ;;  %v441_v35 = vrot.slane %v398_v4, 4 }
 0x151   :  { %v4162_v42 = vperm.slane %v418_v25, %v3715_v51  ;;  %v370_v55 = vsel %vm143_vm1, %v244_v18, %v369_v40  ;;  %v382_v37 = vsel %vm143_vm1, %v3912_v10, %v381_v38  ;;  %v394_v13 = vsel %vm143_vm1, %v3902_v9, %v393_v63 }
 0x152   :  { %v464_v59 = vsel %vm143_vm1, %v463_v58, %v422_v2  ;;  %v341_v45 = vrot.slane %v4154_v33, 4  ;;  %v442_v22 = vsel %vm143_vm1, %v410_v16, %v441_v35  ;;  %v378_v4 = vperm.slane %v370_v55, %v3698_v26 }
 0x153   :  { %3350 = vmatmul.msk.f32.vlgmr.msra.gmra.mxu3 %vm1595_vm2, %v464_v59  ;;  %v390_v28 = vperm.slane %v382_v37, %v3698_v26  ;;  %v305_v18 = vrot.slane %v262_v15, 4  ;;  %v450_v10 = vperm.slane %v442_v22, %v3715_v51  ;;  %v402_v61 = vperm.slane %v394_v13, %v3698_v26 }
 0x154   :  { %3355 = vmatpush.xpose.msk.msra.mxu3 %vm1595_vm2, %v962_v5  ;;  %v406_v9 = vsel %vm143_vm1, %v3888_v19, %v405_v39  ;;  %v469_v63 = vrot.slane %v4162_v42, 4  ;;  %v429_v16 = vrot.slane %v378_v4, 4  ;;  %v465_v38 = vrot.slane %v422_v2, 4 }
 0x155   :  { %v414_v40 = vperm.slane %v406_v9, %v3698_v26  ;;  %v467_v44 = vrot.slane %v450_v10, 4  ;;  %v453_v54 = vrot.slane %v402_v61, 4  ;;  %v966_v56 = vsel %vm143_vm1, %v4032_v8, %v965_v34 }
 0x156   :  { %v267_v0 = vrot.slane %v115_v60, 4  ;;  %v430_v48 = vsel %vm143_vm1, %v390_v28, %v429_v16  ;;  %v5381_v52 = vrot.slane %v3766_v36, 4  ;;  %v427_v39 = vrot.slane %v390_v28, 4 }
 0x157   :  { %v451_v57 = vrot.slane %v414_v40, 4  ;;  %v468_v20 = vsel %vm143_vm1, %v467_v44, %v4162_v42  ;;  %v438_v12 = vperm.slane %v430_v48, %v3715_v51  ;;  %v454_v5 = vsel %vm143_vm1, %v414_v40, %v453_v54 }
 0x158   :  { %v270_v19 = vsel %vm143_vm1, %v115_v60, %v5381_v52  ;;  %v268_v24 = vsel %vm143_vm1, %v267_v0, %v3766_v36  ;;  %3354 = vmatmul.msk.f32.vlgmr.msra.gmra.mxu2 %vm1595_vm2, %v468_v20  ;;  %v462_v8 = vperm.slane %v454_v5, %v3715_v51  ;;  %v428_v58 = vsel %vm143_vm1, %v427_v39, %v378_v4  ;;  %v127_v36 = vpop.permute.xlu1 %126  ;;  %v139_v0 = vpop.permute.xlu0 %138 }
 0x159   :  { %v274_v34 = vperm.slane %v268_v24, %v3698_v26  ;;  %v278_v2 = vperm.slane %v270_v19, %v3698_v26  ;;  %v477_v25 = vrot.slane %v438_v12, 4  ;;  %v466_v42 = vsel %vm143_vm1, %v446_v17, %v465_v38 }
 0x15a   :  { %v4207_v35 = vperm.slane %v428_v58, %v3715_v51  ;;  %v452_v59 = vsel %vm143_vm1, %v451_v57, %v402_v61  ;;  %v475_v55 = vrot.slane %v462_v8, 4  ;;  %v293_v16 = vrot.slane %v127_v36, 4 }
 0x15b   :  { %3352 = vmatmul.msk.f32.vlgmr.msrb.gmra.mxu3 %vm1595_vm2, %v466_v42  ;;  %v303_v37 = vrot.slane %v274_v34, 4  ;;  %v306_v13 = vsel %vm143_vm1, %v274_v34, %v305_v18  ;;  %v315_v22 = vrot.slane %v278_v2, 4  ;;  %v478_v28 = vsel %vm143_vm1, %v462_v8, %v477_v25 }
 0x15c   :  { %3359 = vmatpush.xpose.msk.msrb.mxu3 %vm1595_vm2, %v966_v56  ;;  %v4215_v4 = vperm.slane %v306_v13, %v3715_v51  ;;  %v318_v17 = vsel %vm143_vm1, %v278_v2, %v317_v27  ;;  %v4219_v60 = vperm.slane %v452_v59, %v3715_v51  ;;  %v476_v61 = vsel %vm143_vm1, %v475_v55, %v438_v12 }
 0x15d   :  { %3364 = vmatmul.msk.f32.vlgmr.msrb.gmra.mxu1 %vm1595_vm2, %v478_v28  ;;  %v304_v9 = vsel %vm143_vm1, %v303_v37, %v262_v15  ;;  %v316_v18 = vsel %vm143_vm1, %v315_v22, %v4137_v3  ;;  %v4227_v40 = vperm.slane %v318_v17, %v3715_v51  ;;  %3362 = vmatmul.msk.f32.vlgmr.msrb.gmra.mxu0 %vm1595_vm2, %v476_v61  ;;  %v291_v20 = vrot.slane %v139_v0, 4 }
 0x15e   :  { %v4231_v27 = vperm.slane %v304_v9, %v3715_v51  ;;  %v471_v38 = vrot.slane %v4219_v60, 4  ;;  %v470_v44 = vsel %vm143_vm1, %v450_v10, %v469_v63  ;;  %v322_v54 = vperm.slane %v316_v18, %v3715_v51 }
 0x15f   :  { %v357_v15 = vrot.slane %v4215_v4, 4  ;;  %v4241_v3 = vsel %vm143_vm1, %v851_v14, %v3924_v41  ;;  %v972_v56 = vsel %vm143_vm1, %v971_v49, %v4088_v31  ;;  %v365_v48 = vrot.slane %v4227_v40, 4 }
 0x160   :  { %v472_v10 = vsel %vm143_vm1, %v471_v38, %v4207_v35  ;;  %v473_v63 = vrot.slane %v4207_v35, 4  ;;  %v978_v52 = vperm.slane %v972_v56, %v3698_v26  ;;  %v353_v6 = vrot.slane %v4231_v27, 4 }
 0x161   :  { %3358 = vmatmul.msk.f32.vlgmr.msrb.gmra.mxu2 %vm1595_vm2, %v472_v10  ;;  %v984_v41 = vsel %vm143_vm1, %v983_v23, %v4063_v53  ;;  %v996_v14 = vsel %vm143_vm1, %v995_v32, %v4241_v3  ;;  %v1008_v49 = vsel %vm143_vm1, %v1007_v47, %v4075_v50  ;;  %v361_v29 = vrot.slane %v322_v54, 4 }
 0x162   :  { %v990_v19 = vperm.slane %v984_v41, %v3698_v26  ;;  %v1002_v39 = vperm.slane %v996_v14, %v3698_v26  ;;  %v1014_v57 = vperm.slane %v1008_v49, %v3698_v26  ;;  %v997_v53 = vrot.slane %v4241_v3, 4 }
 0x163   :  { %3356 = vmatmul.msk.f32.vlgmr.msra.gmra.mxu3 %vm1595_vm2, %v470_v44  ;;  %v294_v23 = vsel %vm143_vm1, %v139_v0, %v293_v16  ;;  %v1021_v32 = vrot.slane %v978_v52, 4  ;;  %v292_v24 = vsel %vm143_vm1, %v291_v20, %v127_v36  ;;  %v974_v2 = vsel %vm143_vm1, %v4067_v1, %v973_v62 }
 0x164   :  { %v1019_v12 = vrot.slane %v990_v19, 4  ;;  %v1043_v5 = vrot.slane %v1014_v57, 4  ;;  %v302_v47 = vperm.slane %v294_v23, %v3698_v26  ;;  %v298_v8 = vperm.slane %v292_v24, %v3698_v26 }
 0x165   :  { %v1022_v34 = vsel %vm143_vm1, %v990_v19, %v1021_v32  ;;  %v4282_v58 = vperm.slane %v4146_v21, %v3698_v26  ;;  %v1045_v22 = vrot.slane %v1002_v39, 4 }
 0x166   :  { %v1020_v25 = vsel %vm143_vm1, %v1019_v12, %v978_v52  ;;  %v1044_v42 = vsel %vm143_vm1, %v1043_v5, %v1002_v39  ;;  %v339_v59 = vrot.slane %v302_v47, 4  ;;  %v342_v55 = vsel %vm143_vm1, %v302_v47, %v341_v45 }
 0x167   :  { %v1026_v36 = vperm.slane %v1020_v25, %v3715_v51  ;;  %v1050_v31 = vperm.slane %v1044_v42, %v3715_v51  ;;  %v327_v37 = vrot.slane %v298_v8, 4  ;;  %v330_v1 = vsel %vm143_vm1, %v298_v8, %v329_v7 }
 0x168   :  { %v338_v62 = vperm.slane %v330_v1, %v3715_v51  ;;  %v340_v21 = vsel %vm143_vm1, %v339_v59, %v4154_v33  ;;  %v350_v13 = vperm.slane %v342_v55, %v3715_v51  ;;  %v1030_v0 = vperm.slane %v1022_v34, %v3715_v51 }
 0x169   :  { %v1067_v28 = vrot.slane %v1050_v31, 4  ;;  %v328_v45 = vsel %vm143_vm1, %v327_v37, %v4134_v30  ;;  %v346_v17 = vperm.slane %v340_v21, %v3715_v51  ;;  %v1069_v61 = vrot.slane %v1026_v36, 4 }
 0x16a   :  { %v334_v9 = vperm.slane %v328_v45, %v3715_v51  ;;  %v355_v18 = vrot.slane %v338_v62, 4  ;;  %v4303_v7 = vsel %vm143_vm1, %v338_v62, %v357_v15  ;;  %v363_v16 = vrot.slane %v350_v13, 4 }
 0x16b   :  { %v1068_v38 = vsel %vm143_vm1, %v1067_v28, %v1026_v36  ;;  %v359_v33 = vrot.slane %v346_v17, 4  ;;  %v362_v44 = vsel %vm143_vm1, %v346_v17, %v361_v29  ;;  %v366_v3 = vsel %vm143_vm1, %v350_v13, %v365_v48  ;;  %v4369_v17 = vpop.permute.xlu2 %3424 }
 0x16c   :  { %3365 = vmatpush.xpose.msk.msra.mxu2 %vm1595_vm2, %v1068_v38  ;;  %v351_v30 = vrot.slane %v334_v9, 4  ;;  %v4311_v56 = vsel %vm143_vm1, %v355_v18, %v4215_v4  ;;  %v982_v15 = vperm.slane %v974_v2, %v3698_v26  ;;  %v4316_v10 = vsel %vm143_vm1, %v334_v9, %v353_v6 }
 0x16d   :  { %v360_v52 = vsel %vm143_vm1, %v359_v33, %v322_v54  ;;  %v364_v41 = vsel %vm143_vm1, %v363_v16, %v4227_v40  ;;  %v479_v48 = vrot.slane %v4311_v56, 4  ;;  %v491_v14 = vrot.slane %v4303_v7, 4 }
 0x16e   :  { %v505_v49 = vrot.slane %v360_v52, 4  ;;  %v515_v19 = vrot.slane %v366_v3, 4  ;;  %v517_v4 = vrot.slane %v362_v44, 4  ;;  %v1070_v39 = vsel %vm143_vm1, %v1050_v31, %v1069_v61 }
 0x16f   :  { %v1046_v20 = vsel %vm143_vm1, %v1014_v57, %v1045_v22  ;;  %v998_v6 = vsel %vm143_vm1, %v4079_v46, %v997_v53  ;;  %v1010_v54 = vsel %vm143_vm1, %v4084_v43, %v1009_v11  ;;  %v503_v40 = vrot.slane %v364_v41, 4  ;;  %3367 = vmatpush.xpose.msk.msra.mxu3 %vm1595_vm2, %v1070_v39 }
 0x170   :  { %v4332_v29 = vsel %vm143_vm1, %v364_v41, %v505_v49  ;;  %v516_v23 = vsel %vm143_vm1, %v515_v19, %v362_v44  ;;  %v1054_v32 = vperm.slane %v1046_v20, %v3715_v51  ;;  %v518_v57 = vsel %vm143_vm1, %v366_v3, %v517_v4 }
 0x171   :  { %v522_v12 = vperm.slane %v516_v23, %v3698_v26  ;;  %v1006_v46 = vperm.slane %v998_v6, %v3698_v26  ;;  %v1018_v50 = vperm.slane %v1010_v54, %v3698_v26  ;;  %v1031_v43 = vrot.slane %v4282_v58, 4 }
 0x172   :  { %v1071_v53 = vrot.slane %v1054_v32, 4  ;;  %v1073_v11 = vrot.slane %v1030_v0, 4  ;;  %v1033_v5 = vrot.slane %v982_v15, 4  ;;  %v474_v8 = vsel %vm143_vm1, %v4219_v60, %v473_v63 }
 0x173   :  { %v1055_v24 = vrot.slane %v1018_v50, 4  ;;  %v1057_v47 = vrot.slane %v1006_v46, 4  ;;  %v352_v34 = vsel %vm143_vm1, %v351_v30, %v4231_v27  ;;  %v1032_v25 = vsel %vm143_vm1, %v1031_v43, %v982_v15  ;;  %3360 = vmatmul.msk.f32.vlgmr.msrb.gmra.mxu3 %vm1595_vm2, %v474_v8 }
 0x174   :  { %v1072_v2 = vsel %vm143_vm1, %v1071_v53, %v1030_v0  ;;  %v1074_v42 = vsel %vm143_vm1, %v1054_v32, %v1073_v11  ;;  %v1034_v59 = vsel %vm143_vm1, %v4282_v58, %v1033_v5  ;;  %v493_v55 = vrot.slane %v4316_v10, 4 }
 0x175   :  { %3369 = vmatpush.xpose.msk.msra.mxu0 %vm1595_vm2, %v1072_v2  ;;  %v1038_v35 = vperm.slane %v1032_v25, %v3715_v51  ;;  %v1056_v60 = vsel %vm143_vm1, %v1055_v24, %v1006_v46  ;;  %3371 = vmatpush.xpose.msk.msra.mxu1 %vm1595_vm2, %v1074_v42  ;;  %v1042_v27 = vperm.slane %v1034_v59, %v3715_v51  ;;  %v551_v45 = vrot.slane %v522_v12, 4 }
 0x176   :  { %v1062_v63 = vperm.slane %v1056_v60, %v3715_v51  ;;  %v1058_v36 = vsel %vm143_vm1, %v1018_v50, %v1057_v47  ;;  %v480_v58 = vsel %vm143_vm1, %v479_v48, %v352_v34  ;;  %v492_v31 = vsel %vm143_vm1, %v491_v14, %v4316_v10  ;;  %v3420_v50 = vpop.permute.xlu1 %3419 }
 0x177   :  { %v1066_v37 = vperm.slane %v1058_v36, %v3715_v51  ;;  %v1081_v1 = vrot.slane %v1042_v27, 4  ;;  %v1077_v62 = vrot.slane %v1038_v35, 4  ;;  %v486_v21 = vperm.slane %v480_v58, %v3698_v26 }
 0x178   :  { %v1075_v13 = vrot.slane %v1062_v63, 4  ;;  %v498_v22 = vperm.slane %v492_v31, %v3698_v26  ;;  %v504_v28 = vsel %vm143_vm1, %v503_v40, %v360_v52  ;;  %v481_v33 = vrot.slane %v352_v34, 4 }
 0x179   :  { %v1079_v61 = vrot.slane %v1066_v37, 4  ;;  %v1082_v9 = vsel %vm143_vm1, %v1066_v37, %v1081_v1  ;;  %v1078_v18 = vsel %vm143_vm1, %v1062_v63, %v1077_v62  ;;  %v510_v16 = vperm.slane %v504_v28, %v3698_v26 }
 0x17a   :  { %v1076_v38 = vsel %vm143_vm1, %v1075_v13, %v1038_v35  ;;  %3379 = vmatpush.xpose.msk.msrb.mxu1 %vm1595_vm2, %v1082_v9  ;;  %3375 = vmatpush.xpose.msk.msrb.mxu3 %vm1595_vm2, %v1078_v18  ;;  %v527_v44 = vrot.slane %v498_v22, 4  ;;  %v529_v3 = vrot.slane %v486_v21, 4  ;;  %v3426_v10 = vunpack.i.l.bf16 %v4369_v17 }
 0x17b   :  { %3373 = vmatpush.xpose.msk.msrb.mxu2 %vm1595_vm2, %v1076_v38  ;;  %v1080_v30 = vsel %vm143_vm1, %v1079_v61, %v1042_v27  ;;  %v552_v0 = vsel %vm143_vm1, %v551_v45, %v510_v16  ;;  %v553_v15 = vrot.slane %v510_v16, 4  ;;  %v526_v52 = vperm.slane %v518_v57, %v3698_v26  ;;  %v3430_v27 = vpop.permute.xlu0 %3429 }
 0x17c   :  { %3377 = vmatpush.xpose.msk.msrb.mxu0 %vm1595_vm2, %v1080_v30  ;;  %v528_v41 = vsel %vm143_vm1, %v527_v44, %v486_v21  ;;  %v558_v48 = vperm.slane %v552_v0, %v3715_v51  ;;  %v530_v14 = vsel %vm143_vm1, %v498_v22, %v529_v3  ;;  %v1131_v39 = vrot.slane %v3426_v10, 4 }
 0x17d   :  { %v534_v49 = vperm.slane %v528_v41, %v3715_v51  ;;  %v538_v19 = vperm.slane %v530_v14, %v3715_v51  ;;  %v554_v4 = vsel %vm143_vm1, %v522_v12, %v553_v15  ;;  %v482_v54 = vsel %vm143_vm1, %v4311_v56, %v481_v33 }
 0x17e   :  { %v575_v20 = vrot.slane %v558_v48, 4  ;;  %v562_v6 = vperm.slane %v554_v4, %v3715_v51  ;;  %v494_v40 = vsel %vm143_vm1, %v4303_v7, %v493_v55  ;;  %v490_v57 = vperm.slane %v482_v54, %v3698_v26 }
 0x17f   :  { %v577_v23 = vrot.slane %v534_v49, 4  ;;  %v581_v32 = vrot.slane %v538_v19, 4  ;;  %v502_v46 = vperm.slane %v494_v40, %v3698_v26  ;;  %v514_v43 = vperm.slane %v4332_v29, %v3698_v26 }
 0x180   :  { %v576_v53 = vsel %vm143_vm1, %v575_v20, %v534_v49  ;;  %v579_v12 = vrot.slane %v562_v6, 4  ;;  %v563_v11 = vrot.slane %v526_v52, 4  ;;  %v541_v24 = vrot.slane %v490_v57, 4 }
 0x181   :  { %3366 = vmatmul.msk.f32.vlgmr.msra.gmra.mxu2 %vm1595_vm2, %v576_v53  ;;  %v578_v56 = vsel %vm143_vm1, %v558_v48, %v577_v23  ;;  %v582_v7 = vsel %vm143_vm1, %v562_v6, %v581_v32  ;;  %v539_v5 = vrot.slane %v502_v46, 4  ;;  %v565_v34 = vrot.slane %v514_v43, 4 }
 0x182   :  { %3368 = vmatmul.msk.f32.vlgmr.msra.gmra.mxu3 %vm1595_vm2, %v578_v56  ;;  %v580_v47 = vsel %vm143_vm1, %v579_v12, %v538_v19  ;;  %3372 = vmatmul.msk.f32.vlgmr.msra.gmra.mxu1 %vm1595_vm2, %v582_v7  ;;  %v564_v8 = vsel %vm143_vm1, %v563_v11, %v514_v43  ;;  %v3422_v2 = vunpack.i.h.bf16 %v3420_v50  ;;  %v542_v42 = vsel %vm143_vm1, %v502_v46, %v541_v24 }
 0x183   :  { %3370 = vmatmul.msk.f32.vlgmr.msra.gmra.mxu0 %vm1595_vm2, %v580_v47  ;;  %v540_v29 = vsel %vm143_vm1, %v539_v5, %v490_v57  ;;  %v570_v25 = vperm.slane %v564_v8, %v3715_v51  ;;  %v3421_v59 = vunpack.i.l.bf16 %v3420_v50  ;;  %v550_v35 = vperm.slane %v542_v42, %v3715_v51 }
 0x184   :  { %v546_v55 = vperm.slane %v540_v29, %v3715_v51  ;;  %v566_v60 = vsel %vm143_vm1, %v526_v52, %v565_v34  ;;  %v1145_v21 = vrot.slane %v3422_v2, 4  ;;  %v3431_v22 = vunpack.i.l.bf16 %v3430_v27 }
 0x185   :  { %v583_v63 = vrot.slane %v570_v25, 4  ;;  %v574_v36 = vperm.slane %v566_v60, %v3715_v51  ;;  %v1132_v58 = vsel %vm143_vm1, %v1131_v39, %v3421_v59  ;;  %v1133_v31 = vrot.slane %v3421_v59, 4 }
 0x186   :  { %v585_v37 = vrot.slane %v546_v55, 4  ;;  %v589_v1 = vrot.slane %v550_v35, 4  ;;  %v3427_v28 = vunpack.i.h.bf16 %v4369_v17  ;;  %v1138_v61 = vperm.slane %v1132_v58, %v3698_v26 }
 0x187   :  { %v587_v62 = vrot.slane %v574_v36, 4  ;;  %v1134_v13 = vsel %vm143_vm1, %v3426_v10, %v1133_v31  ;;  %v584_v45 = vsel %vm143_vm1, %v583_v63, %v546_v55  ;;  %v3435_v18 = vpop.permute.xlu1 %3434  ;;  %v1143_v33 = vrot.slane %v3431_v22, 4 }
 0x188   :  { %v1142_v9 = vperm.slane %v1134_v13, %v3698_v26  ;;  %v586_v16 = vsel %vm143_vm1, %v570_v25, %v585_v37  ;;  %v590_v38 = vsel %vm143_vm1, %v574_v36, %v589_v1  ;;  %v1146_v44 = vsel %vm143_vm1, %v3431_v22, %v1145_v21 }
 0x189   :  { %3374 = vmatmul.msk.f32.vlgmr.msrb.gmra.mxu2 %vm1595_vm2, %v584_v45  ;;  %v588_v17 = vsel %vm143_vm1, %v587_v62, %v550_v35  ;;  %v1154_v3 = vperm.slane %v1146_v44, %v3698_v26  ;;  %v3432_v30 = vunpack.i.h.bf16 %v3430_v27  ;;  %v1144_v0 = vsel %vm143_vm1, %v1143_v33, %v3422_v2 }
 0x18a   :  { %3376 = vmatmul.msk.f32.vlgmr.msrb.gmra.mxu3 %vm1595_vm2, %v586_v16  ;;  %3380 = vmatmul.msk.f32.vlgmr.msrb.gmra.mxu1 %vm1595_vm2, %v590_v38  ;;  %v3437_v15 = vunpack.i.h.bf16 %v3435_v18  ;;  %v3436_v10 = vunpack.i.l.bf16 %v3435_v18  ;;  %v1157_v52 = vrot.slane %v3427_v28, 4  ;;  %v1181_v41 = vrot.slane %v1138_v61, 4 }
 0x18b   :  { %3378 = vmatmul.msk.f32.vlgmr.msrb.gmra.mxu0 %vm1595_vm2, %v588_v17  ;;  %v1193_v48 = vrot.slane %v1142_v9, 4  ;;  %v1150_v14 = vperm.slane %v1144_v0, %v3698_v26  ;;  %v1191_v49 = vrot.slane %v1154_v3, 4  ;;  %v1169_v54 = vrot.slane %v3432_v30, 4 }
 0x18c   :  { %v1167_v19 = vrot.slane %v3437_v15, 4  ;;  %v1155_v4 = vrot.slane %v3436_v10, 4  ;;  %v1158_v6 = vsel %vm143_vm1, %v3436_v10, %v1157_v52 }
 0x18d   :  { %v1182_v39 = vsel %vm143_vm1, %v1150_v14, %v1181_v41  ;;  %v1194_v20 = vsel %vm143_vm1, %v1154_v3, %v1193_v48  ;;  %v1179_v40 = vrot.slane %v1150_v14, 4  ;;  %v1166_v57 = vperm.slane %v1158_v6, %v3698_v26 }
 0x18e   :  { %v1156_v23 = vsel %vm143_vm1, %v1155_v4, %v3427_v28  ;;  %v1168_v46 = vsel %vm143_vm1, %v1167_v19, %v3432_v30  ;;  %v1190_v50 = vperm.slane %v1182_v39, %v3715_v51  ;;  %v1192_v53 = vsel %vm143_vm1, %v1191_v49, %v1142_v9 }
 0x18f   :  { %v1162_v32 = vperm.slane %v1156_v23, %v3698_v26  ;;  %v1202_v12 = vperm.slane %v1194_v20, %v3715_v51  ;;  %v1170_v43 = vsel %vm143_vm1, %v3437_v15, %v1169_v54  ;;  %v1174_v11 = vperm.slane %v1168_v46, %v3698_v26 }
 0x190   :  { %v1178_v56 = vperm.slane %v1170_v43, %v3698_v26  ;;  %v1217_v5 = vrot.slane %v1166_v57, 4  ;;  %v1180_v24 = vsel %vm143_vm1, %v1179_v40, %v1138_v61  ;;  %v1198_v29 = vperm.slane %v1192_v53, %v3715_v51 }
 0x191   :  { %v1205_v7 = vrot.slane %v1162_v32, 4  ;;  %v1203_v47 = vrot.slane %v1174_v11, 4  ;;  %v1233_v25 = vrot.slane %v1190_v50, 4  ;;  %v1186_v55 = vperm.slane %v1180_v24, %v3715_v51 }
 0x192   :  { %v1215_v34 = vrot.slane %v1178_v56, 4  ;;  %v1218_v2 = vsel %vm143_vm1, %v1178_v56, %v1217_v5  ;;  %v1241_v35 = vrot.slane %v1202_v12, 4  ;;  %v1237_v62 = vrot.slane %v1198_v29, 4 }
 0x193   :  { %v1206_v8 = vsel %vm143_vm1, %v1174_v11, %v1205_v7  ;;  %v1226_v59 = vperm.slane %v1218_v2, %v3715_v51  ;;  %v1204_v60 = vsel %vm143_vm1, %v1203_v47, %v1162_v32  ;;  %v1229_v28 = vrot.slane %v1186_v55, 4 }
 0x194   :  { %v1214_v42 = vperm.slane %v1206_v8, %v3715_v51  ;;  %v1216_v27 = vsel %vm143_vm1, %v1215_v34, %v1166_v57  ;;  %v1210_v63 = vperm.slane %v1204_v60, %v3715_v51 }
 0x195   :  { %v1222_v36 = vperm.slane %v1216_v27, %v3715_v51  ;;  %v1239_v37 = vrot.slane %v1226_v59, 4  ;;  %v1242_v1 = vsel %vm143_vm1, %v1226_v59, %v1241_v35 }
 0x196   :  { %v1234_v58 = vsel %vm143_vm1, %v1214_v42, %v1233_v25  ;;  %v1231_v31 = vrot.slane %v1214_v42, 4  ;;  %v1227_v21 = vrot.slane %v1210_v63, 4  ;;  %v1391_v61 = vrot.slane %v1242_v1, 4 }
 0x197   :  { %v1235_v13 = vrot.slane %v1222_v36, 4  ;;  %v1367_v22 = vrot.slane %v1234_v58, 4  ;;  %v1240_v45 = vsel %vm143_vm1, %v1239_v37, %v1202_v12  ;;  %v1238_v9 = vsel %vm143_vm1, %v1222_v36, %v1237_v62 }
 0x198   :  { %v1379_v18 = vrot.slane %v1240_v45, 4  ;;  %v1228_v16 = vsel %vm143_vm1, %v1227_v21, %v1186_v55  ;;  %v1230_v38 = vsel %vm143_vm1, %v1210_v63, %v1229_v28  ;;  %v1232_v33 = vsel %vm143_vm1, %v1231_v31, %v1190_v50 }
 0x199   :  { %v1236_v44 = vsel %vm143_vm1, %v1235_v13, %v1198_v29  ;;  %v1355_v17 = vrot.slane %v1232_v33, 4  ;;  %v1357_v3 = vrot.slane %v1228_v16, 4  ;;  %v1368_v30 = vsel %vm143_vm1, %v1367_v22, %v1230_v38 }
 0x19a   :  { %v1369_v0 = vrot.slane %v1230_v38, 4  ;;  %v1374_v15 = vperm.slane %v1368_v30, %v3698_v26  ;;  %v1380_v10 = vsel %vm143_vm1, %v1379_v18, %v1236_v44  ;;  %v1381_v52 = vrot.slane %v1236_v44, 4  ;;  %v1579_v44 = vld [vmem:[%s5375_s2] sm:$0xff] }
 0x19b   :  { %v1392_v41 = vsel %vm143_vm1, %v1391_v61, %v1238_v9  ;;  %v1356_v48 = vsel %vm143_vm1, %v1355_v17, %v1228_v16  ;;  %v1386_v14 = vperm.slane %v1380_v10, %v3698_v26  ;;  %v1393_v19 = vrot.slane %v1238_v9, 4 }
 0x19c   :  { %v1398_v49 = vperm.slane %v1392_v41, %v3698_v26  ;;  %v1362_v4 = vperm.slane %v1356_v48, %v3698_v26  ;;  %v1403_v39 = vrot.slane %v1374_v15, 4  ;;  %v1358_v20 = vsel %vm143_vm1, %v1232_v33, %v1357_v3  ;;  %v1580_v41 = vld [vmem:[%s5375_s2 + $0x8] sm:$0xff] }
 0x19d   :  { %v1370_v54 = vsel %vm143_vm1, %v1234_v58, %v1369_v0  ;;  %v1382_v23 = vsel %vm143_vm1, %v1240_v45, %v1381_v52  ;;  %v1366_v46 = vperm.slane %v1358_v20, %v3698_v26  ;;  %v1394_v12 = vsel %vm143_vm1, %v1242_v1, %v1393_v19  ;;  %v1585_v0 = vld [vmem:[%s5375_s2 + $0x30] sm:$0xff] }
 0x19e   :  { %v1427_v6 = vrot.slane %v1398_v49, 4  ;;  %v1404_v40 = vsel %vm143_vm1, %v1403_v39, %v1362_v4  ;;  %v1378_v50 = vperm.slane %v1370_v54, %v3698_v26  ;;  %v1390_v43 = vperm.slane %v1382_v23, %v3698_v26 }
 0x19f   :  { %v1410_v32 = vperm.slane %v1404_v40, %v3715_v51  ;;  %v1402_v11 = vperm.slane %v1394_v12, %v3698_v26  ;;  %v1405_v24 = vrot.slane %v1362_v4, 4  ;;  %v1429_v47 = vrot.slane %v1386_v14, 4 }
 0x1a0   :  { %v1428_v57 = vsel %vm143_vm1, %v1427_v6, %v1386_v14  ;;  %v1415_v56 = vrot.slane %v1378_v50, 4  ;;  %v1417_v2 = vrot.slane %v1366_v46, 4  ;;  %v1441_v27 = vrot.slane %v1390_v43, 4  ;;  %v1586_v6 = vld [vmem:[%s5375_s2 + $0x38] sm:$0xff] }
 0x1a1   :  { %v1434_v53 = vperm.slane %v1428_v57, %v3715_v51  ;;  %v1453_v5 = vrot.slane %v1410_v32, 4  ;;  %v1439_v34 = vrot.slane %v1402_v11, 4  ;;  %v1406_v59 = vsel %vm143_vm1, %v1374_v15, %v1405_v24  ;;  %v1581_v15 = vld [vmem:[%s5375_s2 + $0x10] sm:$0xff] }
 0x1a2   :  { %v1416_v8 = vsel %vm143_vm1, %v1415_v56, %v1366_v46  ;;  %v1414_v35 = vperm.slane %v1406_v59, %v3715_v51  ;;  %v1430_v60 = vsel %vm143_vm1, %v1398_v49, %v1429_v47  ;;  %v1418_v31 = vsel %vm143_vm1, %v1378_v50, %v1417_v2  ;;  %v1590_v2 = vld [vmem:[%s5375_s2 + $0x58] sm:$0xff]  ;;  %v3440_v59 = vpop.permute.xlu0 %3439 }
 0x1a3   :  { %v1451_v7 = vrot.slane %v1434_v53, 4  ;;  %v1422_v25 = vperm.slane %v1416_v8, %v3715_v51  ;;  %v1454_v42 = vsel %vm143_vm1, %v1434_v53, %v1453_v5  ;;  %v1440_v55 = vsel %vm143_vm1, %v1439_v34, %v1390_v43  ;;  %v1582_v53 = vld [vmem:[%s5375_s2 + $0x18] sm:$0xff]  ;;  %v1587_v8 = vld [vmem:[%s5375_s2 + $0x40] sm:$0xff] }
 0x1a4   :  { %2198 = vmatpush.msra.mxu3 %v1454_v42  ;;  %v1446_v63 = vperm.slane %v1440_v55, %v3715_v51  ;;  %v1438_v36 = vperm.slane %v1430_v60, %v3715_v51  ;;  %v1426_v37 = vperm.slane %v1418_v31, %v3715_v51  ;;  %v1442_v1 = vsel %vm143_vm1, %v1402_v11, %v1441_v27  ;;  %v1584_v60 = vld [vmem:[%s5375_s2 + $0x28] sm:$0xff] }
 0x1a5   :  { %v1452_v29 = vsel %vm143_vm1, %v1451_v7, %v1410_v32  ;;  %v1461_v58 = vrot.slane %v1422_v25, 4  ;;  %v1457_v62 = vrot.slane %v1414_v35, 4  ;;  %v1450_v28 = vperm.slane %v1442_v1, %v3715_v51  ;;  %v1583_v32 = vld [vmem:[%s5375_s2 + $0x20] sm:$0xff]  ;;  %v1589_v7 = vld [vmem:[%s5375_s2 + $0x50] sm:$0xff] }
 0x1a6   :  { %2175 = vmatpush.msra.mxu2 %v1452_v29  ;;  %v1459_v21 = vrot.slane %v1446_v63, 4  ;;  %v1455_v13 = vrot.slane %v1438_v36, 4  ;;  %v1465_v61 = vrot.slane %v1426_v37, 4 }
 0x1a7   :  { %v1462_v22 = vsel %vm143_vm1, %v1446_v63, %v1461_v58  ;;  %v1458_v45 = vsel %vm143_vm1, %v1438_v36, %v1457_v62  ;;  %v1463_v16 = vrot.slane %v1450_v28, 4  ;;  %v1592_v63 = vld [vmem:[%s5375_s2 + $0x68] sm:$0xff]  ;;  %v1594_v58 = vld [vmem:[%s5375_s2 + $0x78] sm:$0xff] }
 0x1a8   :  { %2290 = vmatpush.msrb.mxu3 %v1462_v22  ;;  %v1460_v9 = vsel %vm143_vm1, %v1459_v21, %v1422_v25  ;;  %v1456_v18 = vsel %vm143_vm1, %v1455_v13, %v1414_v35  ;;  %2244 = vmatpush.msra.mxu1 %v1458_v45  ;;  %v1466_v38 = vsel %vm143_vm1, %v1450_v28, %v1465_v61  ;;  %v1588_v22 = vld [vmem:[%s5375_s2 + $0x48] sm:$0xff] }
 0x1a9   :  { %2267 = vmatpush.msrb.mxu2 %v1460_v9  ;;  %2221 = vmatpush.msra.mxu0 %v1456_v18  ;;  %v1464_v33 = vsel %vm143_vm1, %v1463_v16, %v1426_v37  ;;  %v1591_v18 = vld [vmem:[%s5375_s2 + $0x60] sm:$0xff] }
 0x1aa   :  { %2336 = vmatpush.msrb.mxu1 %v1466_v38  ;;  %v3445_v62 = vpop.permute.xlu0 %3444 }
 0x1ab   :  { %2313 = vmatpush.msrb.mxu0 %v1464_v33 }
 0x1b2   :  { %v3450_v38 = vpop.permute.xlu0 %3449 }
 0x1d6   :  { %v1619_v17 = vpop.f32.mrf.mxu3 }
 0x1d7   :  { %v4506_v3 = vadd.f32 %v1619_v17, %v1579_v44  ;;  %v1593_v17 = vld [vmem:[%s5375_s2 + $0x70] sm:$0xff]  ;;  %s3559_s2 = smov 4  }
 0x1d9   :  { %v2013_v30 = vsel %vm2012_vm3, %v4506_v3, -inf }
 0x1da   :  { %2014 = vmax.xlane.f32.xlu2 %v2013_v30  ;;  %v1775_v10 = vpop.f32.mrf.mxu0  ;;  %v1801_v54 = vpop.f32.mrf.mxu1 }
 0x1db   :  { %v1671_v52 = vpop.f32.mrf.mxu2  ;;  %v4519_v48 = vadd.f32 %v1775_v10, %v1585_v0  ;;  %v4534_v40 = vadd.f32 %v1801_v54, %v1586_v6  ;;  %v3455_v0 = vpop.permute.xlu0 %3454  ;;  %v3441_v10 = vunpack.i.l.bf16 %v3440_v59  ;;  %v3451_v54 = vunpack.i.l.bf16 %v3450_v38 }
 0x1dc   :  { %v4521_v14 = vadd.f32 %v1671_v52, %v1581_v15  ;;  %v3447_v52 = vunpack.i.h.bf16 %v3445_v62 }
 0x1dd   :  { %v2031_v20 = vsel %vm2012_vm3, %v4519_v48, -inf  ;;  %v2034_v23 = vsel %vm2012_vm3, %v4534_v40, -inf }
 0x1de   :  { %v1645_v49 = vpop.f32.mrf.mxu3  ;;  %v2019_v19 = vsel %vm2012_vm3, %v4521_v14, -inf  ;;  %v1269_v6 = vrot.slane %v3447_v52, 4 }
 0x1df   :  { %v4525_v4 = vadd.f32 %v1645_v49, %v1580_v41  ;;  %2020 = vmax.xlane.f32.xlu0 %v2019_v19  ;;  %v3442_v41 = vunpack.i.h.bf16 %v3440_v59  ;;  %v3446_v49 = vunpack.i.l.bf16 %v3445_v62  ;;  %v3456_v19 = vunpack.i.l.bf16 %v3455_v0 }
 0x1e1   :  { %v2016_v39 = vsel %vm2012_vm3, %v4525_v4, -inf }
 0x1e2   :  { %2017 = vmax.xlane.f32.xlu1 %v2016_v39  ;;  %2032 = vmax.xlane.f32.xlu2 %v2031_v20  ;;  %v1245_v20 = vrot.slane %v3441_v10, 4 }
 0x1e4   :  { %v1723_v57 = vpop.f32.mrf.mxu2 }
 0x1e5   :  { %v4541_v46 = vadd.f32 %v1723_v57, %v1583_v32  ;;  %v1243_v32 = vrot.slane %v3446_v49, 4  ;;  %v1246_v57 = vsel %vm143_vm1, %v3446_v49, %v1245_v20 }
 0x1e6   :  { %v1697_v12 = vpop.f32.mrf.mxu3 }
 0x1e7   :  { %v2025_v50 = vsel %vm2012_vm3, %v4541_v46, -inf  ;;  %v4548_v43 = vadd.f32 %v1697_v12, %v1582_v53  ;;  %v1267_v53 = vrot.slane %v3456_v19, 4  ;;  %v1270_v12 = vsel %vm143_vm1, %v3456_v19, %v1269_v6 }
 0x1e9   :  { %v2022_v11 = vsel %vm2012_vm3, %v4548_v43, -inf }
 0x1ea   :  { %2035 = vmax.xlane.f32.xlu2 %v2034_v23  ;;  %v1257_v23 = vrot.slane %v3442_v41, 4 }
 0x1f2   :  { %2026 = vmax.xlane.f32.xlu2 %v2025_v50  ;;  %v3452_v50 = vunpack.i.h.bf16 %v3450_v38 }
 0x1f6   :  { %v1749_v56 = vpop.f32.mrf.mxu3 }
 0x1f7   :  { %v4574_v27 = vadd.f32 %v1749_v56, %v1584_v60  ;;  %v1258_v56 = vsel %vm143_vm1, %v3451_v54, %v1257_v23 }
 0x1f9   :  { %v2028_v13 = vsel %vm2012_vm3, %v4574_v27, -inf }
 0x1fa   :  { %2023 = vmax.xlane.f32.xlu2 %v2022_v11  ;;  %v1255_v11 = vrot.slane %v3451_v54, 4 }
 0x1ff   :  { %v1905_v47 = vpop.f32.mrf.mxu1 }
 0x200   :  { %v1879_v5 = vpop.f32.mrf.mxu0  ;;  %v4567_v55 = vadd.f32 %v1905_v47, %v1590_v2  ;;  %v1278_v47 = vperm.slane %v1270_v12, %v3698_v26  ;;  %v1268_v2 = vsel %vm143_vm1, %v1267_v53, %v3447_v52 }
 0x201   :  { %v4555_v24 = vadd.f32 %v1879_v5, %v1589_v7  ;;  %v3457_v7 = vunpack.i.h.bf16 %v3455_v0  ;;  %v1254_v5 = vperm.slane %v1246_v57, %v3698_v26 }
 0x202   :  { %v2046_v36 = vsel %vm2012_vm3, %v4567_v55, -inf }
 0x203   :  { %v2043_v34 = vsel %vm2012_vm3, %v4555_v24, -inf  ;;  %v1279_v59 = vrot.slane %v3457_v7, 4 }
 0x204   :  { %v1827_v29 = vpop.f32.mrf.mxu2  ;;  %2044 = vmax.xlane.f32.xlu2 %v2043_v34  ;;  %v1281_v34 = vrot.slane %v3452_v50, 4 }
 0x205   :  { %v4565_v25 = vadd.f32 %v1827_v29, %v1587_v8  ;;  %v1853_v42 = vpop.f32.mrf.mxu3  ;;  %v1244_v8 = vsel %vm143_vm1, %v1243_v32, %v3441_v10  ;;  %v1266_v29 = vperm.slane %v1258_v56, %v3698_v26 }
 0x206   :  { %v4595_v45 = vadd.f32 %v1853_v42, %v1588_v22  ;;  %v1256_v42 = vsel %vm143_vm1, %v1255_v11, %v3442_v41  ;;  %v1250_v60 = vperm.slane %v1244_v8, %v3698_v26  ;;  %v1280_v22 = vsel %vm143_vm1, %v1279_v59, %v3452_v50 }
 0x207   :  { %v2037_v35 = vsel %vm2012_vm3, %v4565_v25, -inf  ;;  %v2009_v31 = vpop.f32.mrf.mxu1  ;;  %v1286_v38 = vperm.slane %v1280_v22, %v3698_v26 }
 0x208   :  { %2038 = vmax.xlane.f32.xlu1 %v2037_v35  ;;  %v4586_v21 = vadd.f32 %v2009_v31, %v1594_v58  ;;  %v2040_v9 = vsel %vm2012_vm3, %v4595_v45, -inf  ;;  %v1983_v30 = vpop.f32.mrf.mxu0  ;;  %v1282_v35 = vsel %vm143_vm1, %v3457_v7, %v1281_v34  ;;  %v1329_v58 = vrot.slane %v1278_v47, 4 }
 0x209   :  { %v4611_v15 = vadd.f32 %v1983_v30, %v1593_v17  ;;  %v1262_v31 = vperm.slane %v1256_v42, %v3698_v26  ;;  %v1290_v62 = vperm.slane %v1282_v35, %v3698_v26  ;;  %v1315_v19 = vrot.slane %v1286_v38, 4 }
 0x20a   :  { %v2058_v61 = vsel %vm2012_vm3, %v4586_v21, -inf }
 0x20b   :  { %v2055_v39 = vsel %vm2012_vm3, %v4611_v15, -inf  ;;  %v1291_v17 = vrot.slane %v1262_v31, 4 }
 0x20c   :  { %2047 = vmax.xlane.f32.xlu2 %v2046_v36  ;;  %v1931_v16 = vpop.f32.mrf.mxu2  ;;  %v1274_v36 = vperm.slane %v1268_v2, %v3698_v26 }
 0x20d   :  { %v1957_v37 = vpop.f32.mrf.mxu3  ;;  %v4604_v33 = vadd.f32 %v1931_v16, %v1591_v18  ;;  %v1292_v20 = vsel %vm143_vm1, %v1291_v17, %v1250_v60 }
 0x20e   :  { %v4584_v1 = vadd.f32 %v1957_v37, %v1592_v63  ;;  %v1305_v63 = vrot.slane %v1254_v5, 4  ;;  %v1298_v50 = vperm.slane %v1292_v20, %v3715_v51  ;;  %v1316_v53 = vsel %vm143_vm1, %v1315_v19, %v1274_v36 }
 0x20f   :  { %v2049_v44 = vsel %vm2012_vm3, %v4604_v33, -inf }
 0x210   :  { %2029 = vmax.xlane.f32.xlu1 %v2028_v13  ;;  %v2052_v28 = vsel %vm2012_vm3, %v4584_v1, -inf  ;;  %v1306_v37 = vsel %vm143_vm1, %v1266_v29, %v1305_v63  ;;  %v1303_v13 = vrot.slane %v1266_v29, 4  ;;  %v1341_v59 = vrot.slane %v1298_v50, 4 }
 0x211   :  { %2053 = vmax.xlane.f32.xlu0 %v2052_v28  ;;  %v1293_v28 = vrot.slane %v1250_v60, 4  ;;  %v1314_v18 = vperm.slane %v1306_v37, %v3715_v51 }
 0x212   :  { %v1304_v30 = vsel %vm143_vm1, %v1303_v13, %v1254_v5 }
 0x213   :  { %v1294_v16 = vsel %vm143_vm1, %v1262_v31, %v1293_v28  ;;  %v1353_v41 = vrot.slane %v1314_v18, 4  ;;  %v1310_v49 = vperm.slane %v1304_v30, %v3715_v51 }
 0x214   :  { %2059 = vmax.xlane.f32.xlu2 %v2058_v61  ;;  %v1317_v61 = vrot.slane %v1274_v36, 4  ;;  %v1302_v52 = vperm.slane %v1294_v16, %v3715_v51 }
 0x215   :  { %v1349_v11 = vrot.slane %v1310_v49, 4 }
 0x216   :  { %v1318_v10 = vsel %vm143_vm1, %v1286_v38, %v1317_v61  ;;  %v1345_v32 = vrot.slane %v1302_v52, 4 }
 0x217   :  { %v1326_v6 = vperm.slane %v1318_v10, %v3715_v51 }
 0x218   :  { %2041 = vmax.xlane.f32.xlu1 %v2040_v9  ;;  %v1330_v9 = vsel %vm143_vm1, %v1290_v62, %v1329_v58 }
 0x219   :  { %v1338_v0 = vperm.slane %v1330_v9, %v3715_v51  ;;  %v1343_v56 = vrot.slane %v1326_v6, 4  ;;  %v4648_v7 = vsel %vm143_vm1, %v1326_v6, %v1345_v32 }
 0x21a   :  { %v1479_v2 = vrot.slane %v4648_v7, 4 }
 0x21b   :  { %v1351_v54 = vrot.slane %v1338_v0, 4  ;;  %v1354_v23 = vsel %vm143_vm1, %v1338_v0, %v1353_v41  ;;  %v1344_v35 = vsel %vm143_vm1, %v1343_v56, %v1302_v52 }
 0x21c   :  { %v1503_v12 = vrot.slane %v1354_v23, 4  ;;  %v1467_v31 = vrot.slane %v1344_v35, 4 }
 0x21d   :  { %v1352_v5 = vsel %vm143_vm1, %v1351_v54, %v1314_v18 }
 0x21e   :  { %v1491_v29 = vrot.slane %v1352_v5, 4 }
 0x220   :  { %2050 = vmax.xlane.f32.xlu1 %v2049_v44  ;;  %v1327_v44 = vrot.slane %v1290_v62, 4 }
 0x228   :  { %2056 = vmax.xlane.f32.xlu1 %v2055_v39  ;;  %v1328_v39 = vsel %vm143_vm1, %v1327_v44, %v1278_v47  ;;  %v1322_v47 = vperm.slane %v1316_v53, %v3715_v51 }
 0x229   :  { %v1334_v57 = vperm.slane %v1328_v39, %v3715_v51 }
 0x22a   :  { %v1339_v60 = vrot.slane %v1322_v47, 4  ;;  %v1342_v63 = vsel %vm143_vm1, %v1322_v47, %v1341_v59 }
 0x22b   :  { %v1347_v8 = vrot.slane %v1334_v57, 4  ;;  %v1350_v34 = vsel %vm143_vm1, %v1334_v57, %v1349_v11  ;;  %v1480_v37 = vsel %vm143_vm1, %v1479_v2, %v1342_v63 }
 0x22c   :  { %v1504_v42 = vsel %vm143_vm1, %v1503_v12, %v1350_v34  ;;  %v1340_v13 = vsel %vm143_vm1, %v1339_v60, %v1298_v50  ;;  %v1486_v22 = vperm.slane %v1480_v37, %v3698_v26  ;;  %v1505_v39 = vrot.slane %v1350_v34, 4 }
 0x22d   :  { %v1348_v36 = vsel %vm143_vm1, %v1347_v8, %v1310_v49  ;;  %v1510_v58 = vperm.slane %v1504_v42, %v3698_v26  ;;  %v1468_v9 = vsel %vm143_vm1, %v1467_v31, %v1340_v13  ;;  %v1469_v10 = vrot.slane %v1340_v13, 4 }
 0x22e   :  { %v1492_v62 = vsel %vm143_vm1, %v1491_v29, %v1348_v36  ;;  %v1493_v16 = vrot.slane %v1348_v36, 4  ;;  %v1474_v44 = vperm.slane %v1468_v9, %v3698_v26  ;;  %v1515_v17 = vrot.slane %v1486_v22, 4 }
 0x22f   :  { %v1498_v28 = vperm.slane %v1492_v62, %v3698_v26  ;;  %v1539_v61 = vrot.slane %v1510_v58, 4  ;;  %v1470_v32 = vsel %vm143_vm1, %v1344_v35, %v1469_v10  ;;  %v1481_v8 = vrot.slane %v1342_v63, 4 }
 0x230   :  { %v1494_v49 = vsel %vm143_vm1, %v1352_v5, %v1493_v16  ;;  %v1516_v19 = vsel %vm143_vm1, %v1515_v17, %v1474_v44  ;;  %v1517_v6 = vrot.slane %v1474_v44, 4  ;;  %v1478_v2 = vperm.slane %v1470_v32, %v3698_v26 }
 0x231   :  { %v1540_v30 = vsel %vm143_vm1, %v1539_v61, %v1498_v28  ;;  %v1541_v52 = vrot.slane %v1498_v28, 4  ;;  %v1502_v57 = vperm.slane %v1494_v49, %v3698_v26  ;;  %v1522_v12 = vperm.slane %v1516_v19, %v3715_v51 }
 0x232   :  { %v1546_v41 = vperm.slane %v1540_v30, %v3715_v51  ;;  %v1518_v34 = vsel %vm143_vm1, %v1486_v22, %v1517_v6  ;;  %v1506_v29 = vsel %vm143_vm1, %v1354_v23, %v1505_v39  ;;  %v1529_v31 = vrot.slane %v1478_v2, 4 }
 0x233   :  { %v1542_v54 = vsel %vm143_vm1, %v1510_v58, %v1541_v52  ;;  %v1553_v60 = vrot.slane %v1502_v57, 4  ;;  %v1514_v63 = vperm.slane %v1506_v29, %v3698_v26  ;;  %v1526_v36 = vperm.slane %v1518_v34, %v3715_v51 }
 0x234   :  { %v1563_v11 = vrot.slane %v1546_v41, 4  ;;  %v1482_v58 = vsel %vm143_vm1, %v4648_v7, %v1481_v8  ;;  %v1565_v13 = vrot.slane %v1522_v12, 4 }
 0x235   :  { %v1554_v37 = vsel %vm143_vm1, %v1514_v63, %v1553_v60  ;;  %v1490_v61 = vperm.slane %v1482_v58, %v3698_v26  ;;  %v1569_v8 = vrot.slane %v1526_v36, 4 }
 0x236   :  { %v1562_v16 = vperm.slane %v1554_v37, %v3715_v51 }
 0x237   :  { %v1530_v44 = vsel %vm143_vm1, %v1490_v61, %v1529_v31  ;;  %v1527_v39 = vrot.slane %v1490_v61, 4 }
 0x238   :  { %v1538_v10 = vperm.slane %v1530_v44, %v3715_v51  ;;  %v1575_v52 = vrot.slane %v1562_v16, 4 }
 0x23a   :  { %v1576_v6 = vsel %vm143_vm1, %v1575_v52, %v1538_v10  ;;  %v1577_v60 = vrot.slane %v1538_v10, 4 }
 0x24d   :  { %v2015_v18 = vpop.xlane.xlu2 %2014 }
 0x24e   :  { %v2061_v38 = vsub.f32 %v4506_v3, %v2015_v18 }
 0x250   :  { %v2077_v0 = vmul.f32 1.442695, %v2061_v38 }
 0x252   :  { %3459 = vpow2.f32 %v2077_v0  ;;  %v2021_v20 = vpop.xlane.xlu0 %2020  ;;  %v1551_v0 = vrot.slane %v1514_v63, 4 }
 0x253   :  { %v2063_v3 = vsub.f32 %v4521_v14, %v2021_v20  ;;  %v4680_v14 = vperm.slane %v1542_v54, %v3715_v51 }
 0x254   :  { %v1552_v20 = vsel %vm143_vm1, %v1551_v0, %v1502_v57 }
 0x255   :  { %v2018_v50 = vpop.xlane.xlu1 %2017  ;;  %v2033_v53 = vpop.xlane.xlu2 %2032  ;;  %v2081_v56 = vmul.f32 1.442695, %v2063_v3  ;;  %v1567_v23 = vrot.slane %v4680_v14, 4  ;;  %v4713_v32 = vperm.slane %v1552_v20, %v3715_v51 }
 0x256   :  { %v2062_v5 = vsub.f32 %v4525_v4, %v2018_v50  ;;  %v2067_v47 = vsub.f32 %v4519_v48, %v2033_v53  ;;  %v1564_v4 = vsel %vm143_vm1, %v1563_v11, %v1522_v12  ;;  %v1528_v50 = vsel %vm143_vm1, %v1527_v39, %v1478_v2 }
 0x257   :  { %3461 = vpow2.f32 %v2081_v56  ;;  %v1568_v9 = vsel %vm143_vm1, %v1567_v23, %v1526_v36  ;;  %v4717_v53 = vperm.slane %v1528_v50, %v3715_v51  ;;  %v1571_v57 = vrot.slane %v4713_v32, 4 }
 0x258   :  { %v3460_v42 = vpop.eup %3459  ;;  %v2079_v59 = vmul.f32 1.442695, %v2062_v5  ;;  %v2089_v35 = vmul.f32 1.442695, %v2067_v47 }
 0x259   :  { %3381 = vmatmul.msk.f32.vlgmr.msra.gmra.mxu2 %vm2012_vm3, %v3460_v42  ;;  %v2109_v48 = vsel %vm2012_vm3, %v3460_v42, 0.0  ;;  %v1572_v5 = vsel %vm143_vm1, %v1571_v57, %v4717_v53 }
 0x25a   :  { %3463 = vpow2.f32 %v2079_v59  ;;  %2359 = vmatpush.msra.mxu2 %v1564_v4  ;;  %2110 = vadd.xlane.f32.xlu2 %v2109_v48 }
 0x25b   :  { %3465 = vpow2.f32 %v2089_v35 }
 0x25d   :  { %v2036_v62 = vpop.xlane.xlu2 %2035  ;;  %v3462_v22 = vpop.eup %3461 }
 0x25e   :  { %v2068_v28 = vsub.f32 %v4534_v40, %v2036_v62  ;;  %3383 = vmatmul.msk.f32.vlgmr.msra.gmra.mxu0 %vm2012_vm3, %v3462_v22  ;;  %v2115_v18 = vsel %vm2012_vm3, %v3462_v22, 0.0  ;;  %v1566_v40 = vsel %vm143_vm1, %v1546_v41, %v1565_v13 }
 0x25f   :  { %2405 = vmatpush.msra.mxu0 %v1568_v9  ;;  %2116 = vadd.xlane.f32.xlu0 %v2115_v18 }
 0x260   :  { %v4699_v38 = vpop.eup %3463  ;;  %v2091_v7 = vmul.f32 1.442695, %v2068_v28 }
 0x261   :  { %v3466_v17 = vpop.eup %3465  ;;  %3382 = vmatmul.msk.f32.vlgmr.msra.gmra.mxu3 %vm2012_vm3, %v4699_v38 }
 0x262   :  { %3467 = vpow2.f32 %v2091_v7  ;;  %2382 = vmatpush.msra.mxu3 %v1566_v40  ;;  %v2127_v30 = vsel %vm2012_vm3, %v3466_v17, 0.0 }
 0x263   :  { %2128 = vadd.xlane.f32.xlu1 %v2127_v30 }
 0x265   :  { %v2027_v49 = vpop.xlane.xlu2 %2026 }
 0x266   :  { %v2065_v19 = vsub.f32 %v4541_v46, %v2027_v49  ;;  %3387 = vmatmul.msk.f32.vlgmr.msrb.gmra.mxu0 %vm2012_vm3, %v3466_v17 }
 0x267   :  { %2497 = vmatpush.msrb.mxu0 %v1576_v6 }
 0x268   :  { %v3468_v41 = vpop.eup %3467  ;;  %v2085_v3 = vmul.f32 1.442695, %v2065_v19 }
 0x269   :  { %v2130_v54 = vsel %vm2012_vm3, %v3468_v41, 0.0 }
 0x26a   :  { %3469 = vpow2.f32 %v2085_v3 }
 0x26b   :  { %2131 = vadd.xlane.f32.xlu1 %v2130_v54 }
 0x26d   :  { %v2024_v46 = vpop.xlane.xlu2 %2023 }
 0x26e   :  { %v2064_v12 = vsub.f32 %v4548_v43, %v2024_v46  ;;  %v1570_v43 = vsel %vm143_vm1, %v4680_v14, %v1569_v8 }
 0x270   :  { %v3470_v11 = vpop.eup %3469  ;;  %v2083_v56 = vmul.f32 1.442695, %v2064_v12 }
 0x271   :  { %3385 = vmatmul.msk.f32.vlgmr.msrb.gmra.mxu2 %vm2012_vm3, %v3470_v11  ;;  %v2121_v47 = vsel %vm2012_vm3, %v3470_v11, 0.0 }
 0x272   :  { %3471 = vpow2.f32 %v2083_v56  ;;  %2451 = vmatpush.msrb.mxu2 %v1572_v5 }
 0x273   :  { %2122 = vadd.xlane.f32.xlu1 %v2121_v47 }
 0x277   :  { %v2045_v34 = vpop.xlane.xlu2 %2044 }
 0x278   :  { %v4725_v2 = vpop.eup %3471  ;;  %v2071_v29 = vsub.f32 %v4555_v24, %v2045_v34  ;;  %v1578_v24 = vsel %vm143_vm1, %v1562_v16, %v1577_v60 }
 0x279   :  { %3384 = vmatmul.msk.f32.vlgmr.msra.gmra.mxu1 %vm2012_vm3, %v4725_v2  ;;  %v2118_v54 = vsel %vm2012_vm3, %v4725_v2, 0.0 }
 0x27a   :  { %v2097_v42 = vmul.f32 1.442695, %v2071_v29  ;;  %2428 = vmatpush.msra.mxu1 %v1570_v43 }
 0x27b   :  { %v2039_v59 = vpop.xlane.xlu1 %2038 }
 0x27c   :  { %v2069_v35 = vsub.f32 %v4565_v25, %v2039_v59  ;;  %3473 = vpow2.f32 %v2097_v42 }
 0x27e   :  { %v2093_v4 = vmul.f32 1.442695, %v2069_v35 }
 0x27f   :  { %v2048_v48 = vpop.xlane.xlu2 %2047 }
 0x280   :  { %3475 = vpow2.f32 %v2093_v4  ;;  %v2072_v63 = vsub.f32 %v4567_v55, %v2048_v48 }
 0x281   :  { %3388 = vmatmul.msk.f32.vlgmr.msrb.gmra.mxu1 %vm2012_vm3, %v3468_v41 }
 0x282   :  { %v3474_v36 = vpop.eup %3473  ;;  %v2099_v23 = vmul.f32 1.442695, %v2072_v63  ;;  %2520 = vmatpush.msrb.mxu1 %v1578_v24 }
 0x283   :  { %v2030_v14 = vpop.xlane.xlu1 %2029  ;;  %3391 = vmatmul.msk.f32.vlgmr.msra.gmra.mxu0 %vm2012_vm3, %v3474_v36  ;;  %v2139_v58 = vsel %vm2012_vm3, %v3474_v36, 0.0 }
 0x284   :  { %v2066_v25 = vsub.f32 %v4574_v27, %v2030_v14  ;;  %3477 = vpow2.f32 %v2099_v23  ;;  %2140 = vadd.xlane.f32.xlu2 %v2139_v58  ;;  %v2054_v62 = vpop.xlane.xlu0 %2053  ;;  %v1573_v27 = vrot.slane %v4717_v53, 4 }
 0x285   :  { %v2074_v61 = vsub.f32 %v4584_v1, %v2054_v62 }
 0x286   :  { %v3476_v31 = vpop.eup %3475  ;;  %v2087_v37 = vmul.f32 1.442695, %v2066_v25  ;;  %v1574_v1 = vsel %vm143_vm1, %v4713_v32, %v1573_v27 }
 0x287   :  { %3389 = vmatmul.msk.f32.vlgmr.msra.gmra.mxu2 %vm2012_vm3, %v3476_v31  ;;  %v2133_v55 = vsel %vm2012_vm3, %v3476_v31, 0.0  ;;  %v2060_v13 = vpop.xlane.xlu2 %2059  ;;  %v2103_v17 = vmul.f32 1.442695, %v2074_v61 }
 0x288   :  { %3479 = vpow2.f32 %v2087_v37  ;;  %2134 = vadd.xlane.f32.xlu1 %v2133_v55  ;;  %v2076_v22 = vsub.f32 %v4586_v21, %v2060_v13 }
 0x28a   :  { %v3478_v28 = vpop.eup %3477  ;;  %v2107_v9 = vmul.f32 1.442695, %v2076_v22 }
 0x28b   :  { %v2042_v18 = vpop.xlane.xlu1 %2041  ;;  %3392 = vmatmul.msk.f32.vlgmr.msra.gmra.mxu1 %vm2012_vm3, %v3478_v28  ;;  %v2142_v16 = vsel %vm2012_vm3, %v3478_v28, 0.0 }
 0x28c   :  { %v2070_v7 = vsub.f32 %v4595_v45, %v2042_v18  ;;  %3481 = vpow2.f32 %v2107_v9  ;;  %2143 = vadd.xlane.f32.xlu2 %v2142_v16  ;;  %v2112_v45 = vsel %vm2012_vm3, %v4699_v38, 0.0 }
 0x28e   :  { %v3480_v44 = vpop.eup %3479  ;;  %v2095_v40 = vmul.f32 1.442695, %v2070_v7 }
 0x28f   :  { %3386 = vmatmul.msk.f32.vlgmr.msrb.gmra.mxu3 %vm2012_vm3, %v3480_v44 }
 0x290   :  { %3483 = vpow2.f32 %v2095_v40  ;;  %2474 = vmatpush.msrb.mxu3 %v1574_v1 }
 0x291   :  { %3485 = vpow2.f32 %v2103_v17 }
 0x292   :  { %v3482_v21 = vpop.eup %3481 }
 0x293   :  { %v2051_v30 = vpop.xlane.xlu1 %2050  ;;  %3396 = vmatmul.msk.f32.vlgmr.msrb.gmra.mxu1 %vm2012_vm3, %v3482_v21  ;;  %v2154_v50 = vsel %vm2012_vm3, %v3482_v21, 0.0 }
 0x294   :  { %v2073_v0 = vsub.f32 %v4604_v33, %v2051_v30  ;;  %2113 = vadd.xlane.f32.xlu2 %v2112_v45 }
 0x296   :  { %v3484_v10 = vpop.eup %3483  ;;  %v2101_v52 = vmul.f32 1.442695, %v2073_v0 }
 0x297   :  { %3390 = vmatmul.msk.f32.vlgmr.msra.gmra.mxu3 %vm2012_vm3, %v3484_v10  ;;  %v2136_v49 = vsel %vm2012_vm3, %v3484_v10, 0.0  ;;  %v3486_v19 = vpop.eup %3485 }
 0x298   :  { %3487 = vpow2.f32 %v2101_v52  ;;  %2137 = vadd.xlane.f32.xlu1 %v2136_v49  ;;  %v2148_v20 = vsel %vm2012_vm3, %v3486_v19, 0.0 }
 0x29b   :  { %v2057_v39 = vpop.xlane.xlu1 %2056 }
 0x29c   :  { %v2075_v6 = vsub.f32 %v4611_v15, %v2057_v39  ;;  %2149 = vadd.xlane.f32.xlu2 %v2148_v20  ;;  %v2124_v15 = vsel %vm2012_vm3, %v3480_v44, 0.0 }
 0x29e   :  { %v3488_v41 = vpop.eup %3487  ;;  %v2105_v38 = vmul.f32 1.442695, %v2075_v6 }
 0x29f   :  { %3393 = vmatmul.msk.f32.vlgmr.msrb.gmra.mxu2 %vm2012_vm3, %v3488_v41  ;;  %3394 = vmatmul.msk.f32.vlgmr.msrb.gmra.mxu3 %vm2012_vm3, %v3486_v19  ;;  %v2145_v32 = vsel %vm2012_vm3, %v3488_v41, 0.0 }
 0x2a0   :  { %3489 = vpow2.f32 %v2105_v38 }
 0x2a6   :  { %v3490_v33 = vpop.eup %3489 }
 0x2a7   :  { %3395 = vmatmul.msk.f32.vlgmr.msrb.gmra.mxu0 %vm2012_vm3, %v3490_v33  ;;  %v2151_v3 = vsel %vm2012_vm3, %v3490_v33, 0.0 }
 0x2a8   :  { %2152 = vadd.xlane.f32.xlu0 %v2151_v3 }
 0x2b0   :  { %2119 = vadd.xlane.f32.xlu0 %v2118_v54 }
 0x2b8   :  { %2125 = vadd.xlane.f32.xlu0 %v2124_v15 }
 0x2c0   :  { %2146 = vadd.xlane.f32.xlu0 %v2145_v32 }
 0x2c8   :  { %2155 = vadd.xlane.f32.xlu0 %v2154_v50 }
 0x2cd   :  { %v2111_v53 = vpop.xlane.xlu2 %2110 }
 0x2ce   :  { %3491 = vrcp.f32 %v2111_v53  ;;  %v2536_v4 = vand.u32 2147483648, %v2111_v53  ;;  %vm2530_vm5 = vweird.f32 %v2111_v53  ;;  %v2534_v24 = vand.u32 2147483647, %v2111_v53 }
 0x2d0   :  { %v2537_v37 = vor.u32 1.1754944e-38, %v2536_v4  ;;  %vm2535_vm9 = vcmp.eq.f32.partialorder %v2534_v24, 8.507059e+37 }
 0x2d2   :  { %v2117_v57 = vpop.xlane.xlu0 %2116 }
 0x2d3   :  { %3493 = vrcp.f32 %v2117_v57  ;;  %v2564_v31 = vand.u32 2147483648, %v2117_v57  ;;  %vm2558_vm8 = vweird.f32 %v2117_v57  ;;  %v2562_v13 = vand.u32 2147483647, %v2117_v57 }
 0x2d4   :  { %v3492_v11 = vpop.eup %3491 }
 0x2d5   :  { %v2526_v56 = vmul.f32 %v3492_v11, %v2111_v53  ;;  %vm2531_vm4 = vweird.f32 %v3492_v11  ;;  %v2565_v27 = vor.u32 1.1754944e-38, %v2564_v31  ;;  %vm2563_vm11 = vcmp.eq.f32.partialorder %v2562_v13, 8.507059e+37 }
 0x2d6   :  { %v4767_v46 = vpop.xlane.xlu1 %2128  ;;  %vm4787_vm6 = vmor %vm2530_vm5, %vm2531_vm4 }
 0x2d7   :  { %3495 = vrcp.f32 %v4767_v46  ;;  %v2527_v47 = vsub.f32 1.0, %v2526_v56  ;;  %v2618_v30 = vand.u32 2147483647, %v4767_v46  ;;  %v2620_v45 = vand.u32 2147483648, %v4767_v46 }
 0x2d8   :  { %vm2614_vm13 = vweird.f32 %v4767_v46 }
 0x2d9   :  { %v3494_v5 = vpop.eup %3493  ;;  %v2528_v29 = vmul.f32 %v3492_v11, %v2527_v47  ;;  %vm4837_vm15 = vcmp.eq.f32.partialorder %v2618_v30, 8.507059e+37  ;;  %v2621_v15 = vor.u32 1.1754944e-38, %v2620_v45 }
 0x2da   :  { %v2554_v8 = vmul.f32 %v3494_v5, %v2117_v57  ;;  %vm2559_vm7 = vweird.f32 %v3494_v5 }
 0x2db   :  { %v2529_v60 = vadd.f32 %v3492_v11, %v2528_v29  ;;  %vm2560_vm10 = vmor %vm2558_vm8, %vm2559_vm7  ;;  %v2223_v1 = vpop.f32.mrf.mxu0 }
 0x2dc   :  { %v2555_v2 = vsub.f32 1.0, %v2554_v8  ;;  %v2177_v16 = vpop.f32.mrf.mxu2 }
 0x2dd   :  { %v4775_v43 = vpop.eup %3495  ;;  %v2533_v58 = vsel %vm4787_vm6, %v3492_v11, %v2529_v60 }
 0x2de   :  { %v4769_v12 = vpop.xlane.xlu1 %2131  ;;  %v2610_v59 = vmul.f32 %v4775_v43, %v4767_v46  ;;  %v2556_v35 = vmul.f32 %v3494_v5, %v2555_v2  ;;  %v2538_v22 = vsel %vm2535_vm9, %v2537_v37, %v2533_v58  ;;  %vm2615_vm12 = vweird.f32 %v4775_v43 }
 0x2df   :  { %v4808_v17 = vmul.f32 %v2538_v22, %v2177_v16  ;;  %vm4833_vm14 = vmor %vm2614_vm13, %vm2615_vm12  ;;  %v2632_v32 = vand.u32 2147483647, %v4769_v12  ;;  %v2634_v46 = vand.u32 2147483648, %v4769_v12 }
 0x2e0   :  { %v2611_v23 = vsub.f32 1.0, %v2610_v59  ;;  %v2557_v14 = vadd.f32 %v3494_v5, %v2556_v35 }
 0x2e1   :  { %v2767_v41 = vrot.slane %v4808_v17, 4 }
 0x2e2   :  { %v2561_v61 = vsel %vm2560_vm10, %v3494_v5, %v2557_v14  ;;  %v2612_v9 = vmul.f32 %v4775_v43, %v2611_v23 }
 0x2e3   :  { %v2566_v21 = vsel %vm2563_vm11, %v2565_v27, %v2561_v61  ;;  %v2315_v23 = vpop.f32.mrf.mxu0 }
 0x2e4   :  { %v2613_v10 = vadd.f32 %v4775_v43, %v2612_v9  ;;  %v4823_v6 = vmul.f32 %v2566_v21, %v2223_v1  ;;  %v4848_v57 = vpop.f32.mrf.mxu3 }
 0x2e6   :  { %v4772_v34 = vpop.xlane.xlu1 %2122  ;;  %v2617_v50 = vsel %vm4833_vm14, %v4775_v43, %v2613_v10  ;;  %v2765_v8 = vrot.slane %v4823_v6, 4  ;;  %v4858_v2 = vsel %vm143_vm1, %v4823_v6, %v2767_v41 }
 0x2e7   :  { %3497 = vrcp.f32 %v4772_v34  ;;  %v2592_v29 = vand.u32 2147483648, %v4772_v34  ;;  %v2622_v59 = vsel %vm4837_vm15, %v2621_v15, %v2617_v50  ;;  %vm2586_vm5 = vweird.f32 %v4772_v34 }
 0x2e8   :  { %v2590_v35 = vand.u32 2147483647, %v4772_v34  ;;  %v4890_v9 = vmul.f32 %v2622_v59, %v2315_v23  ;;  %v4942_v59 = vperm.slane %v4858_v2, %v3698_v26 }
 0x2ea   :  { %vm2591_vm10 = vcmp.eq.f32.partialorder %v2590_v35, 8.507059e+37 }
 0x2ed   :  { %v4784_v63 = vpop.eup %3497 }
 0x2ee   :  { %v2582_v62 = vmul.f32 %v4784_v63, %v4772_v34  ;;  %vm2587_vm4 = vweird.f32 %v4784_v63 }
 0x2ef   :  { %vm4869_vm6 = vmor %vm2586_vm5, %vm2587_vm4 }
 0x2f0   :  { %v2583_v7 = vsub.f32 1.0, %v2582_v62  ;;  %v2593_v62 = vor.u32 1.1754944e-38, %v2592_v29 }
 0x2f2   :  { %v2584_v19 = vmul.f32 %v4784_v63, %v2583_v7 }
 0x2f4   :  { %v2585_v11 = vadd.f32 %v4784_v63, %v2584_v19  ;;  %v2269_v37 = vpop.f32.mrf.mxu2  ;;  %v2766_v19 = vsel %vm143_vm1, %v2765_v8, %v4808_v17 }
 0x2f6   :  { %v4827_v38 = vpop.f32.mrf.mxu1  ;;  %v2589_v14 = vsel %vm4869_vm6, %v4784_v63, %v2585_v11 }
 0x2f7   :  { %v4777_v42 = vpop.xlane.xlu2 %2140 }
 0x2f8   :  { %3499 = vrcp.f32 %v4777_v42  ;;  %v2674_v24 = vand.u32 2147483647, %v4777_v42  ;;  %v2676_v36 = vand.u32 2147483648, %v4777_v42  ;;  %vm2670_vm9 = vweird.f32 %v4777_v42 }
 0x2fa   :  { %vm2675_vm13 = vcmp.eq.f32.partialorder %v2674_v24, 8.507059e+37  ;;  %v2677_v7 = vor.u32 1.1754944e-38, %v2676_v36 }
 0x2fb   :  { %v4782_v48 = vpop.xlane.xlu1 %2134 }
 0x2fc   :  { %3501 = vrcp.f32 %v4782_v48  ;;  %v2646_v13 = vand.u32 2147483647, %v4782_v48  ;;  %v2648_v22 = vand.u32 2147483648, %v4782_v48  ;;  %vm2642_vm12 = vweird.f32 %v4782_v48 }
 0x2fd   :  { %3503 = vrcp.f32 %v4769_v12 }
 0x2fe   :  { %v4793_v25 = vpop.eup %3499  ;;  %v4900_v27 = vpop.f32.mrf.mxu1  ;;  %vm2647_vm5 = vcmp.eq.f32.partialorder %v2646_v13, 8.507059e+37 }
 0x2ff   :  { %v4798_v55 = vpop.xlane.xlu2 %2143  ;;  %v2666_v18 = vmul.f32 %v4793_v25, %v4777_v42  ;;  %vm2671_vm7 = vweird.f32 %v4793_v25 }
 0x300   :  { %3505 = vrcp.f32 %v4798_v55  ;;  %vm4894_vm11 = vmor %vm2670_vm9, %vm2671_vm7  ;;  %v2688_v45 = vand.u32 2147483647, %v4798_v55  ;;  %v2690_v10 = vand.u32 2147483648, %v4798_v55  ;;  %vm2684_vm6 = vweird.f32 %v4798_v55  ;;  %v2407_v54 = vpop.f32.mrf.mxu0 }
 0x301   :  { %v2667_v52 = vsub.f32 1.0, %v2666_v18  ;;  %v2594_v18 = vsel %vm2591_vm10, %v2593_v62, %v2589_v14 }
 0x302   :  { %v4801_v28 = vpop.eup %3501  ;;  %vm2689_vm9 = vcmp.eq.f32.partialorder %v2688_v45, 8.507059e+37 }
 0x303   :  { %v2638_v44 = vmul.f32 %v4801_v28, %v4782_v48  ;;  %v4810_v40 = vpop.eup %3503  ;;  %v2668_v53 = vmul.f32 %v4793_v25, %v2667_v52  ;;  %vm2643_vm8 = vweird.f32 %v4801_v28 }
 0x304   :  { %v4831_v33 = vmul.f32 %v4810_v40, %v4769_v12  ;;  %vm4907_vm14 = vmor %vm2642_vm12, %vm2643_vm8  ;;  %vm2629_vm4 = vweird.f32 %v4810_v40 }
 0x305   :  { %v2639_v49 = vsub.f32 1.0, %v2638_v44  ;;  %v2669_v4 = vadd.f32 %v4793_v25, %v2668_v53  ;;  %v2635_v44 = vor.u32 1.1754944e-38, %v2634_v46 }
 0x306   :  { %v4814_v0 = vpop.eup %3505  ;;  %v2625_v43 = vsub.f32 1.0, %v4831_v33 }
 0x307   :  { %v2680_v39 = vmul.f32 %v4814_v0, %v4798_v55  ;;  %v4821_v20 = vpop.xlane.xlu2 %2113  ;;  %v2640_v5 = vmul.f32 %v4801_v28, %v2639_v49  ;;  %v2673_v16 = vsel %vm4894_vm11, %v4793_v25, %v2669_v4  ;;  %vm2685_vm15 = vweird.f32 %v4814_v0 }
 0x308   :  { %3507 = vrcp.f32 %v4821_v20  ;;  %v2649_v25 = vor.u32 1.1754944e-38, %v2648_v22  ;;  %v2678_v52 = vsel %vm2675_vm13, %v2677_v7, %v2673_v16  ;;  %vm4927_vm7 = vmor %vm2684_vm6, %vm2685_vm15  ;;  %v2626_v17 = vmul.f32 %v4810_v40, %v2625_v43  ;;  %v2430_v14 = vpop.f32.mrf.mxu1 }
 0x309   :  { %v2681_v56 = vsub.f32 1.0, %v2680_v39  ;;  %v2641_v34 = vadd.f32 %v4801_v28, %v2640_v5  ;;  %v2753_v39 = vmul.f32 %v2594_v18, %v2269_v37  ;;  %v2759_v53 = vmul.f32 %v2678_v52, %v2407_v54 }
 0x30a   :  { %v2361_v11 = vpop.f32.mrf.mxu2  ;;  %v4947_v43 = vperm.slane %v2766_v19, %v3698_v26  ;;  %vm2628_vm13 = vweird.f32 %v4769_v12  ;;  %vm4967_vm15 = vcmp.eq.f32.partialorder %v2632_v32, 8.507059e+37  ;;  %v2548_v54 = vand.u32 2147483647, %v4821_v20 }
 0x30b   :  { %v4852_v47 = vpop.xlane.xlu1 %2137  ;;  %v2682_v58 = vmul.f32 %v4814_v0, %v2681_v56  ;;  %v2645_v48 = vsel %vm4907_vm14, %v4801_v28, %v2641_v34  ;;  %v2691_v56 = vor.u32 1.1754944e-38, %v2690_v10  ;;  %v2791_v4 = vrot.slane %v2753_v39, 4  ;;  %vm4961_vm14 = vmor %vm2628_vm13, %vm2629_vm4 }
 0x30c   :  { %3509 = vrcp.f32 %v4852_v47  ;;  %v2650_v6 = vsel %vm2647_vm5, %v2649_v25, %v2645_v48  ;;  %v2662_v33 = vand.u32 2147483648, %v4852_v47  ;;  %v2660_v55 = vand.u32 2147483647, %v4852_v47 }
 0x30d   :  { %v2683_v21 = vadd.f32 %v4814_v0, %v2682_v58  ;;  %v2757_v5 = vmul.f32 %v2650_v6, %v2361_v11  ;;  %vm2656_vm10 = vweird.f32 %v4852_v47  ;;  %v2877_v23 = vrot.slane %v2759_v53, 4 }
 0x30e   :  { %v4888_v61 = vpop.eup %3507  ;;  %v2663_v60 = vor.u32 1.1754944e-38, %v2662_v33  ;;  %vm2661_vm12 = vcmp.eq.f32.partialorder %v2660_v55, 8.507059e+37  ;;  %v2789_v34 = vrot.slane %v4890_v9, 4  ;;  %v2792_v18 = vsel %vm143_vm1, %v4890_v9, %v2791_v4 }
 0x30f   :  { %v4883_v31 = vpop.xlane.xlu2 %2149  ;;  %v2540_v28 = vmul.f32 %v4888_v61, %v4821_v20  ;;  %v2687_v15 = vsel %vm4927_vm7, %v4814_v0, %v2683_v21  ;;  %v2879_v58 = vrot.slane %v2757_v5, 4  ;;  %v2815_v48 = vrot.slane %v4947_v43, 4 }
 0x310   :  { %3511 = vrcp.f32 %v4883_v31  ;;  %v2692_v0 = vsel %vm2689_vm9, %v2691_v56, %v2687_v15  ;;  %v2878_v21 = vsel %vm143_vm1, %v2877_v23, %v2757_v5  ;;  %vm2545_vm4 = vweird.f32 %v4888_v61 }
 0x311   :  { %v2541_v8 = vsub.f32 1.0, %v2540_v28  ;;  %v2760_v62 = vmul.f32 %v2692_v0, %v2430_v14  ;;  %v2880_v25 = vsel %vm143_vm1, %v2759_v53, %v2879_v58  ;;  %v4988_v46 = vperm.slane %v2792_v18, %v3698_v26 }
 0x312   :  { %v3510_v42 = vpop.eup %3509  ;;  %v4917_v30 = vpop.f32.mrf.mxu3  ;;  %vm2544_vm5 = vweird.f32 %v4821_v20  ;;  %v2884_v6 = vperm.slane %v2878_v21, %v3698_v26  ;;  %v2888_v41 = vperm.slane %v2880_v25, %v3698_v26  ;;  %v2716_v55 = vand.u32 2147483647, %v4883_v31 }
 0x313   :  { %v2652_v1 = vmul.f32 %v3510_v42, %v4852_v47  ;;  %vm2657_vm8 = vweird.f32 %v3510_v42  ;;  %v2627_v47 = vadd.f32 %v4810_v40, %v2626_v17  ;;  %v2542_v37 = vmul.f32 %v4888_v61, %v2541_v8  ;;  %vm5000_vm6 = vmor %vm2544_vm5, %vm2545_vm4 }
 0x314   :  { %vm2658_vm11 = vmor %vm2656_vm10, %vm2657_vm8  ;;  %v2889_v45 = vrot.slane %v2760_v62, 4  ;;  %v2718_v17 = vand.u32 2147483648, %v4883_v31  ;;  %v2851_v5 = vrot.slane %v4988_v46, 4  ;;  %vm2549_vm8 = vcmp.eq.f32.partialorder %v2548_v54, 8.507059e+37 }
 0x315   :  { %v2653_v49 = vsub.f32 1.0, %v2652_v1  ;;  %v2827_v1 = vrot.slane %v4942_v59, 4  ;;  %v2631_v9 = vsel %vm4961_vm14, %v4810_v40, %v2627_v47  ;;  %v2543_v32 = vadd.f32 %v4888_v61, %v2542_v37 }
 0x316   :  { %v4932_v3 = vpop.eup %3511  ;;  %vm2712_vm9 = vweird.f32 %v4883_v31 }
 0x317   :  { %v2654_v50 = vmul.f32 %v3510_v42, %v2653_v49  ;;  %v2708_v35 = vmul.f32 %v4932_v3, %v4883_v31  ;;  %v2550_v49 = vand.u32 2147483648, %v4821_v20  ;;  %v2547_v15 = vsel %vm5000_vm6, %v4888_v61, %v2543_v32 }
 0x318   :  { %vm2713_vm7 = vweird.f32 %v4932_v3  ;;  %v2636_v61 = vsel %vm4967_vm15, %v2635_v44, %v2631_v9 }
 0x319   :  { %v2655_v29 = vadd.f32 %v3510_v42, %v2654_v50  ;;  %v2709_v22 = vsub.f32 1.0, %v2708_v35  ;;  %v2551_v8 = vor.u32 1.1754944e-38, %v2550_v49  ;;  %v2927_v35 = vrot.slane %v2884_v6, 4  ;;  %vm5025_vm10 = vmor %vm2712_vm9, %vm2713_vm7 }
 0x31a   :  { %v2384_v13 = vpop.f32.mrf.mxu3 }
 0x31b   :  { %v2659_v24 = vsel %vm2658_vm11, %v3510_v42, %v2655_v29  ;;  %v4949_v36 = vpop.xlane.xlu0 %2152  ;;  %v2790_v42 = vsel %vm143_vm1, %v2789_v34, %v2753_v39  ;;  %v2710_v40 = vmul.f32 %v4932_v3, %v2709_v22  ;;  %v5020_v29 = vmul.f32 %v2636_v61, %v4900_v27 }
 0x31c   :  { %v2664_v2 = vsel %vm2661_vm12, %v2663_v60, %v2659_v24  ;;  %3513 = vrcp.f32 %v4949_v36  ;;  %v4985_v12 = vperm.slane %v2790_v42, %v3698_v26  ;;  %v2939_v60 = vrot.slane %v2888_v41, 4 }
 0x31d   :  { %v2758_v63 = vmul.f32 %v2664_v2, %v2384_v13  ;;  %v2711_v56 = vadd.f32 %v4932_v3, %v2710_v40  ;;  %v2552_v4 = vsel %vm2549_vm8, %v2551_v8, %v2547_v15  ;;  %vm2717_vm11 = vcmp.eq.f32.partialorder %v2716_v55, 8.507059e+37 }
 0x31e   :  { %v2839_v20 = vrot.slane %v4985_v12, 4  ;;  %v2719_v2 = vor.u32 1.1754944e-38, %v2718_v17  ;;  %v2730_v13 = vand.u32 2147483647, %v4949_v36  ;;  %v2732_v22 = vand.u32 2147483648, %v4949_v36 }
 0x31f   :  { %v2891_v52 = vrot.slane %v2758_v63, 4  ;;  %v2890_v28 = vsel %vm143_vm1, %v2889_v45, %v2758_v63  ;;  %v2715_v27 = vsel %vm5025_vm10, %v4932_v3, %v2711_v56  ;;  %vm2726_vm13 = vweird.f32 %v4949_v36 }
 0x320   :  { %v2896_v11 = vperm.slane %v2890_v28, %v3698_v26  ;;  %v2720_v63 = vsel %vm2717_vm11, %v2719_v2, %v2715_v27  ;;  %v2801_v25 = vrot.slane %v5020_v29, 4  ;;  %vm2731_vm4 = vcmp.eq.f32.partialorder %v2730_v13, 8.507059e+37 }
 0x321   :  { %v2892_v53 = vsel %vm143_vm1, %v2760_v62, %v2891_v52  ;;  %v2750_v62 = vmul.f32 %v2552_v4, %v4848_v57  ;;  %v2733_v52 = vor.u32 1.1754944e-38, %v2732_v22 }
 0x322   :  { %v4982_v10 = vpop.eup %3513  ;;  %v2900_v24 = vperm.slane %v2892_v53, %v3698_v26  ;;  %v2925_v14 = vrot.slane %v2896_v11, 4  ;;  %v2928_v31 = vsel %vm143_vm1, %v2896_v11, %v2927_v35  ;;  %v2476_v45 = vpop.f32.mrf.mxu3 }
 0x323   :  { %v2722_v19 = vmul.f32 %v4982_v10, %v4949_v36  ;;  %v4996_v39 = vpop.xlane.xlu0 %2119  ;;  %vm2727_vm12 = vweird.f32 %v4982_v10  ;;  %v5045_v16 = vperm.slane %v2928_v31, %v3715_v51  ;;  %v2779_v32 = vrot.slane %v2750_v62, 4  ;;  %v2453_v2 = vpop.f32.mrf.mxu2 }
 0x324   :  { %3515 = vrcp.f32 %v4996_v39  ;;  %v2937_v3 = vrot.slane %v2900_v24, 4  ;;  %v2926_v18 = vsel %vm143_vm1, %v2925_v14, %v2884_v6  ;;  %v2940_v7 = vsel %vm143_vm1, %v2900_v24, %v2939_v60  ;;  %vm5049_vm14 = vmor %vm2726_vm13, %vm2727_vm12  ;;  %v2499_v53 = vpop.f32.mrf.mxu0 }
 0x325   :  { %v2723_v50 = vsub.f32 1.0, %v2722_v19  ;;  %v2578_v57 = vand.u32 2147483648, %v4996_v39  ;;  %v2576_v21 = vand.u32 2147483647, %v4996_v39  ;;  %v5059_v49 = vmul.f32 %v2720_v63, %v2476_v45 }
 0x326   :  { %v2938_v40 = vsel %vm143_vm1, %v2937_v3, %v2888_v41  ;;  %vm2572_vm5 = vweird.f32 %v4996_v39  ;;  %v5063_v6 = vperm.slane %v2926_v18, %v3715_v51  ;;  %v5066_v33 = vperm.slane %v2940_v7, %v3715_v51 }
 0x327   :  { %v2724_v0 = vmul.f32 %v4982_v10, %v2723_v50  ;;  %v2979_v15 = vrot.slane %v5045_v16, 4  ;;  %vm2577_vm7 = vcmp.eq.f32.partialorder %v2576_v21, 8.507059e+37  ;;  %v2915_v4 = vrot.slane %v5059_v49, 4 }
 0x328   :  { %v2975_v35 = vrot.slane %v5063_v6, 4  ;;  %v2987_v60 = vrot.slane %v5066_v33, 4 }
 0x329   :  { %v2725_v58 = vadd.f32 %v4982_v10, %v2724_v0 }
 0x32a   :  { %v3516_v23 = vpop.eup %3515 }
 0x32b   :  { %v2568_v34 = vmul.f32 %v3516_v23, %v4996_v39  ;;  %v5036_v37 = vpop.xlane.xlu0 %2125  ;;  %vm2573_vm15 = vweird.f32 %v3516_v23  ;;  %v2729_v36 = vsel %vm5049_vm14, %v4982_v10, %v2725_v58  ;;  %v2579_v10 = vor.u32 1.1754944e-38, %v2578_v57 }
 0x32c   :  { %3517 = vrcp.f32 %v5036_v37  ;;  %vm2574_vm6 = vmor %vm2572_vm5, %vm2573_vm15  ;;  %v2734_v54 = vsel %vm2731_vm4, %v2733_v52, %v2729_v36  ;;  %v5074_v39 = vperm.slane %v2938_v40, %v3715_v51  ;;  %v2604_v11 = vand.u32 2147483647, %v5036_v37 }
 0x32d   :  { %v2569_v42 = vsub.f32 1.0, %v2568_v34  ;;  %v5079_v61 = vmul.f32 %v2734_v54, %v2499_v53  ;;  %v2606_v0 = vand.u32 2147483648, %v5036_v37  ;;  %vm2600_vm9 = vweird.f32 %v5036_v37 }
 0x32e   :  { %vm5090_vm10 = vcmp.eq.f32.partialorder %v2604_v11, 8.507059e+37 }
 0x32f   :  { %v2570_v9 = vmul.f32 %v3516_v23, %v2569_v42  ;;  %v2901_v34 = vrot.slane %v5079_v61, 4  ;;  %v2607_v13 = vor.u32 1.1754944e-38, %v2606_v0 }
 0x331   :  { %v2571_v28 = vadd.f32 %v3516_v23, %v2570_v9 }
 0x332   :  { %v3518_v19 = vpop.eup %3517 }
 0x333   :  { %v2575_v50 = vsel %vm2574_vm6, %v3516_v23, %v2571_v28  ;;  %v2596_v41 = vmul.f32 %v3518_v19, %v5036_v37  ;;  %v5071_v55 = vpop.xlane.xlu0 %2146  ;;  %vm2601_vm8 = vweird.f32 %v3518_v19 }
 0x334   :  { %v2580_v17 = vsel %vm2577_vm7, %v2579_v10, %v2575_v50  ;;  %3519 = vrcp.f32 %v5071_v55  ;;  %v2702_v14 = vand.u32 2147483647, %v5071_v55  ;;  %vm2602_vm11 = vmor %vm2600_vm9, %vm2601_vm8  ;;  %vm2698_vm12 = vweird.f32 %v5071_v55 }
 0x335   :  { %v2752_v56 = vmul.f32 %v2580_v17, %v4827_v38  ;;  %v2597_v8 = vsub.f32 1.0, %v2596_v41  ;;  %v2983_v38 = vrot.slane %v5074_v39, 4  ;;  %v2704_v7 = vand.u32 2147483648, %v5071_v55 }
 0x336   :  { %vm5103_vm13 = vcmp.eq.f32.partialorder %v2702_v14, 8.507059e+37  ;;  %vm3276_vm8 = vcmask 130048   ;;  %vm3279_vm9 = vcmask 162816  }
 0x337   :  { %v2777_v24 = vrot.slane %v2752_v56, 4  ;;  %v2780_v47 = vsel %vm143_vm1, %v2752_v56, %v2779_v32  ;;  %v2598_v23 = vmul.f32 %v3518_v19, %v2597_v8  ;;  %v2705_v50 = vor.u32 1.1754944e-38, %v2704_v7 }
 0x338   :  { %v2788_v27 = vperm.slane %v2780_v47, %v3698_v26 }
 0x339   :  { %v2778_v31 = vsel %vm143_vm1, %v2777_v24, %v2750_v62  ;;  %v2599_v58 = vadd.f32 %v3518_v19, %v2598_v23 }
 0x33a   :  { %v3520_v22 = vpop.eup %3519  ;;  %v2784_v3 = vperm.slane %v2778_v31, %v3698_v26  ;;  %v2825_v63 = vrot.slane %v2788_v27, 4  ;;  %v2828_v42 = vsel %vm143_vm1, %v2788_v27, %v2827_v1 }
 0x33b   :  { %v2603_v37 = vsel %vm2602_vm11, %v3518_v19, %v2599_v58  ;;  %v2694_v18 = vmul.f32 %v3520_v22, %v5071_v55  ;;  %v5108_v57 = vpop.xlane.xlu0 %2155  ;;  %vm2699_vm14 = vweird.f32 %v3520_v22  ;;  %v5118_v32 = vperm.slane %v2828_v42, %v3715_v51 }
 0x33c   :  { %v2813_v44 = vrot.slane %v2784_v3, 4  ;;  %v2816_v1 = vsel %vm143_vm1, %v2784_v3, %v2815_v48  ;;  %v2608_v9 = vsel %vm5090_vm10, %v2607_v13, %v2603_v37  ;;  %3521 = vrcp.f32 %v5108_v57  ;;  %vm2700_vm4 = vmor %vm2698_vm12, %vm2699_vm14 }
 0x33d   :  { %v2754_v21 = vmul.f32 %v2608_v9, %v4917_v30  ;;  %v2695_v36 = vsub.f32 1.0, %v2694_v18  ;;  %v2746_v45 = vand.u32 2147483648, %v5108_v57  ;;  %v2824_v40 = vperm.slane %v2816_v1, %v3715_v51 }
 0x33e   :  { %v2814_v52 = vsel %vm143_vm1, %v2813_v44, %v4947_v43  ;;  %v2826_v48 = vsel %vm143_vm1, %v2825_v63, %v4942_v59  ;;  %v2744_v10 = vand.u32 2147483647, %v5108_v57  ;;  %vm2740_vm15 = vweird.f32 %v5108_v57 }
 0x33f   :  { %v2802_v28 = vsel %vm143_vm1, %v2801_v25, %v2754_v21  ;;  %v2803_v30 = vrot.slane %v2754_v21, 4  ;;  %v2696_v19 = vmul.f32 %v3520_v22, %v2695_v36  ;;  %v2747_v41 = vor.u32 1.1754944e-38, %v2746_v45 }
 0x340   :  { %v2808_v54 = vperm.slane %v2802_v28, %v3698_v26  ;;  %v2820_v17 = vperm.slane %v2814_v52, %v3715_v51  ;;  %v2832_v59 = vperm.slane %v2826_v48, %v3715_v51  ;;  %v2867_v11 = vrot.slane %v2824_v40, 4 }
 0x341   :  { %v2804_v43 = vsel %vm143_vm1, %v5020_v29, %v2803_v30  ;;  %v2697_v53 = vadd.f32 %v3520_v22, %v2696_v19  ;;  %v2875_v29 = vrot.slane %v5118_v32, 4  ;;  %vm5146_vm5 = vcmp.eq.f32.partialorder %v2744_v10, 8.507059e+37 }
 0x342   :  { %v3522_v25 = vpop.eup %3521  ;;  %v2812_v56 = vperm.slane %v2804_v43, %v3698_v26  ;;  %v2837_v8 = vrot.slane %v2808_v54, 4  ;;  %v2840_v0 = vsel %vm143_vm1, %v2808_v54, %v2839_v20  ;;  %v2863_v27 = vrot.slane %v2820_v17, 4  ;;  %v2522_v54 = vpop.f32.mrf.mxu1 }
 0x343   :  { %v2848_v24 = vperm.slane %v2840_v0, %v3715_v51  ;;  %v2701_v47 = vsel %vm2700_vm4, %v3520_v22, %v2697_v53  ;;  %v2736_v23 = vmul.f32 %v3522_v25, %v5108_v57  ;;  %vm2741_vm6 = vweird.f32 %v3522_v25 }
 0x344   :  { %v2838_v20 = vsel %vm143_vm1, %v2837_v8, %v4985_v12  ;;  %v2849_v31 = vrot.slane %v2812_v56, 4  ;;  %v2852_v55 = vsel %vm143_vm1, %v2812_v56, %v2851_v5  ;;  %v2706_v58 = vsel %vm5103_vm13, %v2705_v50, %v2701_v47  ;;  %vm2742_vm7 = vmor %vm2740_vm15, %vm2741_vm6 }
 0x345   :  { %v2761_v13 = vmul.f32 %v2706_v58, %v2453_v2  ;;  %v2737_v22 = vsub.f32 1.0, %v2736_v23  ;;  %v2844_v3 = vperm.slane %v2838_v20, %v3715_v51  ;;  %v2860_v42 = vperm.slane %v2852_v55, %v3715_v51 }
 0x346   :  { %v2850_v63 = vsel %vm143_vm1, %v2849_v31, %v4988_v46  ;;  %v2865_v37 = vrot.slane %v2848_v24, 4  ;;  %v5162_v12 = vsel %vm143_vm1, %v2848_v24, %v2867_v11  ;;  %v2871_v9 = vrot.slane %v2832_v59, 4 }
 0x347   :  { %v2902_v5 = vsel %vm143_vm1, %v2901_v34, %v2761_v13  ;;  %v2903_v18 = vrot.slane %v2761_v13, 4  ;;  %v2738_v62 = vmul.f32 %v3522_v25, %v2737_v22  ;;  %v2856_v7 = vperm.slane %v2850_v63, %v3715_v51 }
 0x348   :  { %v5169_v44 = vperm.slane %v2902_v5, %v3698_v26  ;;  %v2861_v1 = vrot.slane %v2844_v3, 4  ;;  %v2866_v46 = vsel %vm143_vm1, %v2865_v37, %v2824_v40  ;;  %v5175_v45 = vsel %vm143_vm1, %v2844_v3, %v2863_v27 }
 0x349   :  { %v2904_v21 = vsel %vm143_vm1, %v5079_v61, %v2903_v18  ;;  %v2739_v36 = vadd.f32 %v3522_v25, %v2738_v62  ;;  %v2869_v52 = vrot.slane %v2856_v7, 4  ;;  %v2872_v40 = vsel %vm143_vm1, %v2856_v7, %v2871_v9 }
 0x34a   :  { %v5178_v34 = vperm.slane %v2904_v21, %v3698_v26  ;;  %v2862_v48 = vsel %vm143_vm1, %v2861_v1, %v2820_v17  ;;  %v2873_v28 = vrot.slane %v2860_v42, 4  ;;  %v2876_v19 = vsel %vm143_vm1, %v2860_v42, %v2875_v29 }
 0x34b   :  { %v2743_v30 = vsel %vm2742_vm7, %v3522_v25, %v2739_v36  ;;  %v2870_v61 = vsel %vm143_vm1, %v2869_v52, %v2832_v59  ;;  %v2989_v10 = vrot.slane %v2866_v46, 4  ;;  %v2951_v50 = vrot.slane %v5169_v44, 4 }
 0x34c   :  { %v2748_v43 = vsel %vm5146_vm5, %v2747_v41, %v2743_v30  ;;  %v2874_v57 = vsel %vm143_vm1, %v2873_v28, %v5118_v32  ;;  %v3001_v17 = vrot.slane %v5162_v12, 4  ;;  %v2963_v53 = vrot.slane %v5178_v34, 4 }
 0x34d   :  { %v2764_v11 = vmul.f32 %v2748_v43, %v2522_v54  ;;  %v2990_v25 = vsel %vm143_vm1, %v2989_v10, %v2862_v48  ;;  %v3013_v59 = vrot.slane %v2874_v57, 4  ;;  %v3015_v0 = vrot.slane %v2870_v61, 4 }
 0x34e   :  { %v2996_v56 = vperm.slane %v2990_v25, %v3698_v26  ;;  %v3002_v8 = vsel %vm143_vm1, %v3001_v17, %v5175_v45  ;;  %v3025_v29 = vrot.slane %v2876_v19, 4  ;;  %v2991_v58 = vrot.slane %v2862_v48, 4 }
 0x34f   :  { %v2913_v24 = vrot.slane %v2764_v11, 4  ;;  %v2916_v32 = vsel %vm143_vm1, %v2764_v11, %v2915_v4  ;;  %v3008_v41 = vperm.slane %v3002_v8, %v3698_v26  ;;  %v3014_v47 = vsel %vm143_vm1, %v3013_v59, %v2870_v61 }
 0x350   :  { %v2924_v23 = vperm.slane %v2916_v32, %v3698_v26  ;;  %v3020_v14 = vperm.slane %v3014_v47, %v3698_v26  ;;  %v3026_v27 = vsel %vm143_vm1, %v3025_v29, %v2872_v40  ;;  %v3039_v2 = vrot.slane %v2996_v56, 4 }
 0x351   :  { %v2914_v20 = vsel %vm143_vm1, %v2913_v24, %v5059_v49  ;;  %v3032_v31 = vperm.slane %v3026_v27, %v3698_v26  ;;  %v3037_v55 = vrot.slane %v3008_v41, 4  ;;  %v3027_v22 = vrot.slane %v2872_v40, 4 }
 0x352   :  { %v2920_v4 = vperm.slane %v2914_v20, %v3698_v26  ;;  %v2961_v13 = vrot.slane %v2924_v23, 4  ;;  %v3040_v3 = vsel %vm143_vm1, %v3008_v41, %v3039_v2  ;;  %v2964_v63 = vsel %vm143_vm1, %v2924_v23, %v2963_v53 }
 0x353   :  { %v3038_v42 = vsel %vm143_vm1, %v3037_v55, %v2996_v56  ;;  %v3061_v37 = vrot.slane %v3032_v31, 4  ;;  %v3048_v5 = vperm.slane %v3040_v3, %v3715_v51  ;;  %v3063_v7 = vrot.slane %v3020_v14, 4 }
 0x354   :  { %v2949_v18 = vrot.slane %v2920_v4, 4  ;;  %v2952_v49 = vsel %vm143_vm1, %v2920_v4, %v2951_v50  ;;  %v5216_v62 = vperm.slane %v3038_v42, %v3715_v51  ;;  %v2992_v36 = vsel %vm143_vm1, %v2866_v46, %v2991_v58 }
 0x355   :  { %v2960_v1 = vperm.slane %v2952_v49, %v3715_v51  ;;  %v3062_v9 = vsel %vm143_vm1, %v3061_v37, %v3020_v14  ;;  %v3091_v21 = vrot.slane %v3048_v5, 4  ;;  %v3064_v40 = vsel %vm143_vm1, %v3032_v31, %v3063_v7 }
 0x356   :  { %v5222_v52 = vperm.slane %v3062_v9, %v3715_v51  ;;  %v3087_v48 = vrot.slane %v5216_v62, 4  ;;  %v3000_v28 = vperm.slane %v2992_v36, %v3698_v26  ;;  %v3072_v30 = vperm.slane %v3064_v40, %v3715_v51 }
 0x357   :  { %v3003_v61 = vrot.slane %v5175_v45, 4  ;;  %v3016_v10 = vsel %vm143_vm1, %v2874_v57, %v3015_v0  ;;  %v3028_v54 = vsel %vm143_vm1, %v2876_v19, %v3027_v22  ;;  %v2972_v50 = vperm.slane %v2964_v63, %v3715_v51 }
 0x358   :  { %v3088_v46 = vsel %vm143_vm1, %v5222_v52, %v3087_v48  ;;  %v3024_v43 = vperm.slane %v3016_v10, %v3698_v26  ;;  %v3036_v17 = vperm.slane %v3028_v54, %v3698_v26  ;;  %v3092_v53 = vsel %vm143_vm1, %v3072_v30, %v3091_v21 }
 0x359   :  { %3215 = vrot.lane.b32.xlu1 %v3088_v46, %s3559_s2  ;;  %v3089_v11 = vrot.slane %v3072_v30, 4  ;;  %v3004_v45 = vsel %vm143_vm1, %v5162_v12, %v3003_v61  ;;  %v3051_v57 = vrot.slane %v3000_v28, 4  ;;  %3231 = vrot.lane.b32.xlu0 %v3092_v53, %s3560_s11  ;;  %v2950_v56 = vsel %vm143_vm1, %v2949_v18, %v5169_v44 }
 0x35a   :  { %v3012_v19 = vperm.slane %v3004_v45, %v3698_v26  ;;  %v3073_v25 = vrot.slane %v3036_v17, 4  ;;  %v3075_v59 = vrot.slane %v3024_v43, 4  ;;  %v2956_v0 = vperm.slane %v2950_v56, %v3715_v51 }
 0x35b   :  { %v3090_v8 = vsel %vm143_vm1, %v3089_v11, %v3048_v5  ;;  %v2962_v29 = vsel %vm143_vm1, %v2961_v13, %v5178_v34  ;;  %v2977_v24 = vrot.slane %v2960_v1, 4  ;;  %v2980_v3 = vsel %vm143_vm1, %v2960_v1, %v2979_v15 }
 0x35c   :  { %3223 = vrot.lane.b32.xlu2 %v3090_v8, %s3561_s12  ;;  %v3049_v12 = vrot.slane %v3012_v19, 4  ;;  %v3074_v32 = vsel %vm143_vm1, %v3073_v25, %v3024_v43  ;;  %v3052_v41 = vsel %vm143_vm1, %v3012_v19, %v3051_v57  ;;  %v3076_v47 = vsel %vm143_vm1, %v3036_v17, %v3075_v59 }
 0x35d   :  { %v3080_v44 = vperm.slane %v3074_v32, %v3715_v51  ;;  %v3060_v23 = vperm.slane %v3052_v41, %v3715_v51  ;;  %v3084_v14 = vperm.slane %v3076_v47, %v3715_v51  ;;  %v2968_v27 = vperm.slane %v2962_v29, %v3715_v51 }
 0x35e   :  { %v3050_v34 = vsel %vm143_vm1, %v3049_v12, %v3000_v28  ;;  %v2973_v2 = vrot.slane %v2956_v0, 4  ;;  %v2976_v20 = vsel %vm143_vm1, %v2956_v0, %v2975_v35  ;;  %v2978_v31 = vsel %vm143_vm1, %v2977_v24, %v5045_v16 }
 0x35f   :  { %v3056_v55 = vperm.slane %v3050_v34, %v3715_v51  ;;  %v3093_v58 = vrot.slane %v3080_v44, 4  ;;  %v3097_v4 = vrot.slane %v3084_v14, 4  ;;  %v3099_v13 = vrot.slane %v3060_v23, 4 }
 0x360   :  { %v2974_v22 = vsel %vm143_vm1, %v2973_v2, %v5063_v6  ;;  %v2981_v63 = vrot.slane %v2968_v27, 4  ;;  %v2984_v35 = vsel %vm143_vm1, %v2968_v27, %v2983_v38  ;;  %v2985_v6 = vrot.slane %v2972_v50, 4 }
 0x361   :  { %v3094_v42 = vsel %vm143_vm1, %v3093_v58, %v3056_v55  ;;  %v3095_v37 = vrot.slane %v3056_v55, 4  ;;  %v3098_v5 = vsel %vm143_vm1, %v3097_v4, %v3060_v23  ;;  %v3100_v18 = vsel %vm143_vm1, %v3084_v14, %v3099_v13 }
 0x362   :  { %3239 = vrot.lane.b32.xlu1 %v3094_v42, %s3562_s13  ;;  %v2982_v16 = vsel %vm143_vm1, %v2981_v63, %v5074_v39  ;;  %v2988_v15 = vsel %vm143_vm1, %v2972_v50, %v2987_v60  ;;  %v3101_v49 = vrot.slane %v2978_v31, 4  ;;  %v3113_v7 = vrot.slane %v2980_v3, 4 }
 0x363   :  { %v3096_v38 = vsel %vm143_vm1, %v3080_v44, %v3095_v37  ;;  %v3127_v1 = vrot.slane %v2982_v16, 4  ;;  %v3137_v9 = vrot.slane %v2988_v15, 4  ;;  %v2986_v39 = vsel %vm143_vm1, %v2985_v6, %v5066_v33 }
 0x364   :  { %3247 = vrot.lane.b32.xlu0 %v3096_v38, %s3563_s14  ;;  %3255 = vrot.lane.b32.xlu2 %v3098_v5, %s3564_s15  ;;  %v3102_v21 = vsel %vm143_vm1, %v3101_v49, %v2974_v22  ;;  %v3139_v36 = vrot.slane %v2984_v35, 4  ;;  %v3103_v48 = vrot.slane %v2974_v22, 4  ;;  %v3114_v40 = vsel %vm143_vm1, %v3113_v7, %v2976_v20 }
 0x365   :  { %v3108_v60 = vperm.slane %v3102_v21, %v3698_v26  ;;  %v3125_v28 = vrot.slane %v2986_v39, 4  ;;  %v3138_v30 = vsel %vm143_vm1, %v3137_v9, %v2984_v35  ;;  %v3120_v61 = vperm.slane %v3114_v40, %v3698_v26  ;;  %v3289_v21 = vld [vmem:[%s5378_s5 + $0x8] sm:$0xff] }
 0x366   :  { %v3144_v10 = vperm.slane %v3138_v30, %v3698_v26  ;;  %v3104_v54 = vsel %vm143_vm1, %v2978_v31, %v3103_v48  ;;  %v3115_v50 = vrot.slane %v2976_v20, 4  ;;  %v3128_v17 = vsel %vm143_vm1, %v2986_v39, %v3127_v1  ;;  %v3290_v39 = vld [vmem:[%s5378_s5 + $0x10] sm:$0xff] }
 0x367   :  { %v3126_v33 = vsel %vm143_vm1, %v3125_v28, %v2982_v16  ;;  %v3151_v46 = vrot.slane %v3108_v60, 4  ;;  %v3112_v43 = vperm.slane %v3104_v54, %v3698_v26  ;;  %v3149_v11 = vrot.slane %v3120_v61, 4 }
 0x368   :  { %v3132_v53 = vperm.slane %v3126_v33, %v3698_v26  ;;  %v3173_v45 = vrot.slane %v3144_v10, 4  ;;  %v3116_v57 = vsel %vm143_vm1, %v2980_v3, %v3115_v50  ;;  %v3136_v59 = vperm.slane %v3128_v17, %v3698_v26 }
 0x369   :  { %v3152_v19 = vsel %vm143_vm1, %v3120_v61, %v3151_v46  ;;  %v3124_v25 = vperm.slane %v3116_v57, %v3698_v26  ;;  %v3140_v56 = vsel %vm143_vm1, %v2988_v15, %v3139_v36  ;;  %v3150_v8 = vsel %vm143_vm1, %v3149_v11, %v3108_v60  ;;  %v3288_v36 = vld [vmem:[%s5378_s5] sm:$0xff] }
 0x36a   :  { %3263 = vrot.lane.b32.xlu1 %v3100_v18, %s3565_s16  ;;  %v3174_v0 = vsel %vm143_vm1, %v3173_v45, %v3132_v53  ;;  %v3160_v29 = vperm.slane %v3152_v19, %v3715_v51  ;;  %v3175_v24 = vrot.slane %v3132_v53, 4  ;;  %v3156_v12 = vperm.slane %v3150_v8, %v3715_v51 }
 0x36b   :  { %v3180_v32 = vperm.slane %v3174_v0, %v3715_v51  ;;  %v3148_v41 = vperm.slane %v3140_v56, %v3698_v26  ;;  %v3161_v47 = vrot.slane %v3124_v25, 4  ;;  %v3085_v44 = vrot.slane %v5222_v52, 4 }
 0x36c   :  { %v3176_v23 = vsel %vm143_vm1, %v3144_v10, %v3175_v24  ;;  %v3203_v14 = vrot.slane %v3160_v29, 4  ;;  %v3187_v27 = vrot.slane %v3136_v59, 4  ;;  %v3199_v2 = vrot.slane %v3156_v12, 4 }
 0x36d   :  { %v3197_v34 = vrot.slane %v3180_v32, 4  ;;  %v3184_v20 = vperm.slane %v3176_v23, %v3715_v51  ;;  %v3162_v31 = vsel %vm143_vm1, %v3161_v47, %v3112_v43  ;;  %v3185_v55 = vrot.slane %v3148_v41, 4  ;;  %v3458_v47 = vld [vmem:[%s5379_s6] ss:$0 sm:$0xff] }
 0x36e   :  { %v3163_v58 = vrot.slane %v3112_v43, 4  ;;  %v3188_v4 = vsel %vm143_vm1, %v3148_v41, %v3187_v27  ;;  %v3200_v13 = vsel %vm143_vm1, %v3180_v32, %v3199_v2  ;;  %v3168_v22 = vperm.slane %v3162_v31, %v3715_v51 }
 0x36f   :  { %v3201_v26 = vrot.slane %v3184_v20, 4  ;;  %3217 = vrot.lane.b32.xlu0 %v3200_v13, %s3559_s2  ;;  %v3204_v52 = vsel %vm143_vm1, %v3184_v20, %v3203_v14  ;;  %v3186_v3 = vsel %vm143_vm1, %v3185_v55, %v3136_v59  ;;  %v3086_v63 = vsel %vm143_vm1, %v3085_v44, %v5216_v62 }
 0x370   :  { %v3192_v42 = vperm.slane %v3186_v3, %v3715_v51  ;;  %v3196_v37 = vperm.slane %v3188_v4, %v3715_v51  ;;  %v3198_v5 = vsel %vm143_vm1, %v3197_v34, %v3156_v12  ;;  %v3164_v18 = vsel %vm143_vm1, %v3124_v25, %v3163_v58 }
 0x371   :  { %v3202_v35 = vsel %vm143_vm1, %v3201_v26, %v3160_v29  ;;  %v3207_v6 = vrot.slane %v3168_v22, 4  ;;  %v3172_v15 = vperm.slane %v3164_v18, %v3715_v51  ;;  %v3291_v51 = vld [vmem:[%s5378_s5 + $0x18] sm:$0xff]  ;;  %vm3282_vm10 = vcmask 195584  }
 0x372   :  { %3225 = vrot.lane.b32.xlu2 %v3202_v35, %s3561_s12  ;;  %3233 = vrot.lane.b32.xlu1 %v3204_v52, %s3560_s11  ;;  %v3205_v16 = vrot.slane %v3192_v42, 4  ;;  %v3209_v49 = vrot.slane %v3196_v37, 4  ;;  %vm3285_vm11 = vcmask 228352  }
 0x373   :  { %v3208_v38 = vsel %vm143_vm1, %v3192_v42, %v3207_v6  ;;  %v3211_v1 = vrot.slane %v3172_v15, 4  ;;  %3314 = vmatpush.msra.mxu2 %v3291_v51 }
 0x374   :  { %v3206_v62 = vsel %vm143_vm1, %v3205_v16, %v3168_v22  ;;  %v3210_v7 = vsel %vm143_vm1, %v3209_v49, %v3172_v15 }
 0x375   :  { %v3212_v9 = vsel %vm143_vm1, %v3196_v37, %v3211_v1  ;;  %3315 = vmatpush.msra.mxu2 %v3290_v39  ;;  %vm3273_vm1 = vcmask 97280  }
 0x377   :  { %3241 = vrot.lane.b32.xlu0 %v3206_v62, %s3562_s13  ;;  %3316 = vmatpush.msra.mxu2 %v3289_v21 }
 0x379   :  { %3317 = vmatpush.msra.mxu2 %v3288_v36 }
 0x37a   :  { %3249 = vrot.lane.b32.xlu2 %v3208_v38, %s3563_s14  ;;  %3257 = vrot.lane.b32.xlu1 %v3210_v7, %s3564_s15 }
 0x37f   :  { %3265 = vrot.lane.b32.xlu0 %v3212_v9, %s3565_s16 }
 0x3b6   :  { %v3224_v28 = vpop.permute.xlu2 %3223 }
 0x3be   :  { %v3256_v46 = vpop.permute.xlu2 %3255 }
 0x3cb   :  { %v3216_v48 = vpop.permute.xlu1 %3215  ;;  %v3232_v60 = vpop.permute.xlu0 %3231 }
 0x3cc   :  { %v3269_v40 = vsel %vm1595_vm2, %v3086_v63, %v3216_v48  ;;  %v3226_v45 = vpop.permute.xlu2 %3225 }
 0x3cd   :  { %v3271_v30 = vsel %vm2012_vm3, %v3269_v40, %v3224_v28 }
 0x3ce   :  { %v3274_v10 = vsel %vm3273_vm1, %v3271_v30, %v3232_v60 }
 0x3d4   :  { %v3240_v61 = vpop.permute.xlu1 %3239  ;;  %v3250_v29 = vpop.permute.xlu2 %3249 }
 0x3d5   :  { %v3277_v54 = vsel %vm3276_vm8, %v3274_v10, %v3240_v61 }
 0x3d6   :  { %v3248_v50 = vpop.permute.xlu0 %3247 }
 0x3d7   :  { %v3280_v33 = vsel %vm3279_vm9, %v3277_v54, %v3248_v50 }
 0x3d8   :  { %v3283_v43 = vsel %vm3282_vm10, %v3280_v33, %v3256_v46 }
 0x3dc   :  { %v3264_v17 = vpop.permute.xlu1 %3263 }
 0x3dd   :  { %v3286_v53 = vsel %vm3285_vm11, %v3283_v43, %v3264_v17 }
 0x3de   :  { %3397 = vmatmul.msk.f32.vlgmr.msra.gmra.mxu2 %vm35_vm0, %v3286_v53 }
 0x3e1   :  { %v3218_v11 = vpop.permute.xlu0 %3217 }
 0x3e2   :  { %v3270_v19 = vsel %vm1595_vm2, %v3198_v5, %v3218_v11 }
 0x3e3   :  { %v3272_v25 = vsel %vm2012_vm3, %v3270_v19, %v3226_v45 }
 0x3e4   :  { %v3234_v57 = vpop.permute.xlu1 %3233 }
 0x3e5   :  { %v3275_v59 = vsel %vm3273_vm1, %v3272_v25, %v3234_v57 }
 0x3e9   :  { %v3242_v56 = vpop.permute.xlu0 %3241 }
 0x3ea   :  { %v3278_v8 = vsel %vm3276_vm8, %v3275_v59, %v3242_v56 }
 0x3eb   :  { %v3281_v24 = vsel %vm3279_vm9, %v3278_v8, %v3250_v29 }
 0x3ec   :  { %v3258_v0 = vpop.permute.xlu1 %3257 }
 0x3ed   :  { %v3284_v12 = vsel %vm3282_vm10, %v3281_v24, %v3258_v0 }
 0x3f1   :  { %v3266_v32 = vpop.permute.xlu0 %3265 }
 0x3f2   :  { %v3287_v41 = vsel %vm3285_vm11, %v3284_v12, %v3266_v32 }
 0x3f3   :  { %3398 = vmatmul.msk.f32.gmra.mxu2 %vm35_vm0, %v3287_v41 }
 0x461   :  { %v3319_v44 = vpop.f32.mrf.mxu2 }
 0x462   :  { %v3320_v23 = vadd.f32 %v3458_v47, %v3319_v44 }
 0x464   :  { %3325 = vst.msk [vmem:[#allocation2] sm:$0xff] %vm35_vm0, %v3320_v23 }
 0x476   :  { %v3322_v14 = vpop.f32.mrf.mxu2 }
 0x477   :  { %v3323_v27 = vadd.f32 %v3458_v47, %v3322_v14 }
 0x479   :  { %3326 = vst.msk [vmem:[#allocation2 + $0x8] sm:$0xff] %vm35_vm0, %v3323_v27 }
 0x47a   :  { %3339 = dma.vmem_to_hbm [thread:$0]  %s3332_s26, 256, %s3334_s1, [#allocation3], %s3567_s27, %s3567_s27, %s3561_s12  }
 0x47b   :  { %3547 = dma.done.wait [#allocation3], 256  }
 0x47c   :  { %3548 = vsyncadd [#allocation3], 4294967040 }
 0x47d   :  { %3344 = vsyncpa [#allocation3], 1 }

</bundles_post_ra>
